<compile_context>
chip_gen: v7x
topology: tpu7x:2x2x1
jax: 0.10.0
libtpu: 0.0.40
codegen_flags: <defaults>
</compile_context>

<pallas_src>
import functools

import jax
import jax.numpy as jnp
from jax.experimental import pallas as pl
from jax.experimental.pallas import tpu as pltpu

KSIZE = 3     # only config consistent with padding=1 and the 32*4*4 flatten
LANE = 128


def _round_up(x, m):
    return (x + m - 1) // m * m


# ---------------------------------------------------------------------------
# Pallas kernels
# ---------------------------------------------------------------------------
def _conv_pool_relu_kernel(p_ref, w_ref, o_ref, *, n_taps):
    """Fused conv-as-GEMM (+ 2x2 max-pool over taps) + ReLU.

    p_ref: (n_taps, bm, K) bf16  im2col patches, one slab per pool tap
    w_ref: (K, C)          bf16  conv weight as a GEMM matrix
    o_ref: (bm, C)         bf16  pooled, ReLU'd activations
    """
    w = w_ref[...]
    acc = jnp.dot(p_ref[0], w, preferred_element_type=jnp.float32)
    for t in range(1, n_taps):                       # max over the 2x2 window taps
        acc = jnp.maximum(acc, jnp.dot(p_ref[t], w,
                                       preferred_element_type=jnp.float32))
    o_ref[...] = jnp.maximum(acc, 0.0).astype(o_ref.dtype)


def _mlp_kernel(x_ref, w1_ref, b1_ref, w2_ref, b2_ref, o_ref):
    """Fused fc1 + fc2 (no activation in between, matching the reference)."""
    h = jnp.dot(x_ref[...], w1_ref[...],
                preferred_element_type=jnp.float32) + b1_ref[...]
    # TODO(synk): dropout branch (use_dropout=True) not implemented; module default is False.
    y = jnp.dot(h.astype(jnp.bfloat16), w2_ref[...],
                preferred_element_type=jnp.float32) + b2_ref[...]
    o_ref[...] = y


# ---------------------------------------------------------------------------
# Pallas wrappers
# ---------------------------------------------------------------------------
def conv_gemm_pool_relu(patches, w_mat, *, block_m=512):
    """relu(max_t(patches[t] @ w_mat)): (T,M,K)bf16 x (K,C)bf16 -> (M,C)bf16."""
    T, M, K = patches.shape
    K2, C = w_mat.shape
    assert K == K2, (K, K2)
    bm = min(M, block_m)                 # >=512-row tiles once batch is large
    grid = (pl.cdiv(M, bm),)
    kernel = functools.partial(_conv_pool_relu_kernel, n_taps=T)
    return pl.pallas_call(
        kernel,
        out_shape=jax.ShapeDtypeStruct((M, C), jnp.bfloat16),
        grid_spec=pltpu.PrefetchScalarGridSpec(
            num_scalar_prefetch=0,
            grid=grid,
            in_specs=[
                pl.BlockSpec((T, bm, K), lambda i: (0, i, 0)),
                pl.BlockSpec((K, C), lambda i: (0, 0)),
            ],
            out_specs=pl.BlockSpec((bm, C), lambda i: (i, 0)),
        ),
        compiler_params=pltpu.CompilerParams(
            dimension_semantics=("parallel",)),
    )(patches, w_mat)


def mlp_fused(x, w1, b1, w2, b2):
    """(x @ w1 + b1) @ w2 + b2; w2/b2 pre-padded so the output is lane-dense."""
    M = x.shape[0]
    npad = w2.shape[1]
    return pl.pallas_call(
        _mlp_kernel,
        out_shape=jax.ShapeDtypeStruct((M, npad), jnp.float32),
        in_specs=[pl.BlockSpec(memory_space=pltpu.MemorySpace.VMEM)] * 5,
        out_specs=pl.BlockSpec(memory_space=pltpu.MemorySpace.VMEM),
    )(x, w1, b1, w2, b2)


# ---------------------------------------------------------------------------
# Glue: im2col (channel-axis concat of shifted views; no big transpose)
# ---------------------------------------------------------------------------
def _pool_tap_patches(x_nhwc, ksize):
    """Patches for stride-1/pad-1 conv followed by 2x2 max-pool, grouped by
    pool tap.  Returns (4, N*Hp*Wp, K) with per-row feature order (ky,kx,cin);
    K is zero-padded up to a multiple of 8."""
    N, H, W, C = x_nhwc.shape
    Hp, Wp = H // 2, W // 2
    xp = jnp.pad(x_nhwc, ((0, 0), (1, 1), (1, 1), (0, 0)))
    taps = []
    for dy in range(2):
        for dx in range(2):
            feats = [
                xp[:, dy + ky: dy + ky + 2 * Hp: 2,
                   dx + kx: dx + kx + 2 * Wp: 2, :]
                for ky in range(ksize) for kx in range(ksize)
            ]
            taps.append(jnp.concatenate(feats, axis=-1)
                        .reshape(N * Hp * Wp, ksize * ksize * C))
    p = jnp.stack(taps, axis=0)
    kpad = _round_up(p.shape[-1], 8)
    if p.shape[-1] < kpad:
        p = jnp.pad(p, ((0, 0), (0, 0), (0, kpad - p.shape[-1])))
    return p


def _conv_patches(x_nhwc, ksize):
    """Patches for a stride-1/pad-1 conv with no pooling: (1, N*H*W, K)."""
    N, H, W, C = x_nhwc.shape
    xp = jnp.pad(x_nhwc, ((0, 0), (1, 1), (1, 1), (0, 0)))
    feats = [xp[:, ky: ky + H, kx: kx + W, :]
             for ky in range(ksize) for kx in range(ksize)]
    p = jnp.concatenate(feats, axis=-1).reshape(N * H * W, ksize * ksize * C)
    kpad = _round_up(p.shape[-1], 8)
    if p.shape[-1] < kpad:
        p = jnp.pad(p, ((0, 0), (0, kpad - p.shape[-1])))
    return p[None]


# ---------------------------------------------------------------------------
# One-time weight preprocessing (layout / dtype / padding)
# ---------------------------------------------------------------------------
def prepare_params(params):
    def conv_w(w):
        o, i, kh, kw = w.shape
        m = jnp.transpose(w, (2, 3, 1, 0)).reshape(kh * kw * i, o)  # (ky,kx,cin) x Cout
        kpad = _round_up(m.shape[0], 8)                             # 27 -> 32 for conv1
        if m.shape[0] < kpad:
            m = jnp.pad(m, ((0, kpad - m.shape[0]), (0, 0)))
        return m.astype(jnp.bfloat16)

    # fc1: fold the torch NCHW-flatten order (c,h,w) -> our NHWC order (h,w,c)
    # into the weight columns, and pre-transpose to (K, N) once.
    w1_t = params["fc1_w"]                                          # (1024, 512)
    fc1_w = jnp.transpose(w1_t.reshape(w1_t.shape[0], 32, 4, 4), (2, 3, 1, 0))
    fc1_w = fc1_w.reshape(32 * 4 * 4, w1_t.shape[0]).astype(jnp.bfloat16)

    # fc2: pre-transpose and pad the output dim to 128 lanes (sliced outside).
    w2_t = params["fc2_w"]                                          # (ncls, 1024)
    ncls = w2_t.shape[0]
    npad = _round_up(ncls, LANE)
    fc2_w = jnp.pad(w2_t.T, ((0, 0), (0, npad - ncls))).astype(jnp.bfloat16)
    fc2_b = jnp.pad(params["fc2_b"], (0, npad - ncls)).astype(jnp.float32).reshape(1, -1)

    prep = {
        "conv1_w": conv_w(params["conv1_w"]),
        "conv2_w": conv_w(params["conv2_w"]),
        "conv3_w": conv_w(params["conv3_w"]),
        "fc1_w": fc1_w,
        "fc1_b": params["fc1_b"].astype(jnp.float32).reshape(1, -1),
        "fc2_w": fc2_w,
        "fc2_b": fc2_b,
    }
    return prep, ncls


# ---------------------------------------------------------------------------
# BaseSVHNet forward
# ---------------------------------------------------------------------------
def base_svhnet_forward(x_nchw, prep, *, ncls):
    N, _, H, W = x_nchw.shape
    x = jnp.transpose(x_nchw, (0, 2, 3, 1)).astype(jnp.bfloat16)     # NHWC bf16 MXU feed

    p1 = _pool_tap_patches(x, KSIZE)                                 # (4, N*(H/2)*(W/2), 32)
    y1 = conv_gemm_pool_relu(p1, prep["conv1_w"]).reshape(N, H // 2, W // 2, 32)

    p2 = _pool_tap_patches(y1, KSIZE)                                # (4, N*(H/4)*(W/4), 288)
    y2 = conv_gemm_pool_relu(p2, prep["conv2_w"]).reshape(N, H // 4, W // 4, 32)

    p3 = _conv_patches(y2, KSIZE)                                    # (1, N*(H/4)*(W/4), 288)
    y3 = conv_gemm_pool_relu(p3, prep["conv3_w"])                    # (N*(H/4)*(W/4), 32)

    # NHWC flatten; fc1_w columns were pre-permuted to match torch's NCHW view.
    xf = y3.reshape(N, 32 * (H // 4) * (W // 4))                     # (N, 512)
    out = mlp_fused(xf, prep["fc1_w"], prep["fc1_b"], prep["fc2_w"], prep["fc2_b"])
    return out[:, :ncls]


# ---------------------------------------------------------------------------
# Deterministic torch-like parameter init (conv bias=False, as in the module)
# ---------------------------------------------------------------------------
def init_params(key, in_channels=3, ksize=3, ncls=10):
    keys = jax.random.split(key, 7)

    def u(k, shape, fan_in):
        bound = 1.0 / (fan_in ** 0.5)
        return jax.random.uniform(k, shape, jnp.float32, -bound, bound)

    return {
        "conv1_w": u(keys[0], (32, in_channels, ksize, ksize), in_channels * ksize * ksize),
        "conv2_w": u(keys[1], (32, 32, ksize, ksize), 32 * ksize * ksize),
        "conv3_w": u(keys[2], (32, 32, ksize, ksize), 32 * ksize * ksize),
        "fc1_w": u(keys[3], (1024, 32 * 4 * 4), 32 * 4 * 4),
        "fc1_b": u(keys[4], (1024,), 32 * 4 * 4),
        "fc2_w": u(keys[5], (ncls, 1024), 1024),
        "fc2_b": u(keys[6], (ncls,), 1024),
    }


if __name__ == "__main__":
    key = jax.random.PRNGKey(0)
    kx, kp = jax.random.split(key)
    # Input must be 16x16 spatial so conv3's output is 4x4 (32*4*4 flatten).
    x = jax.random.normal(kx, (2, 3, 16, 16), jnp.float32)
    params = init_params(kp, in_channels=3, ksize=3, ncls=10)
    prep, ncls = prepare_params(params)

    fwd = jax.jit(base_svhnet_forward, static_argnames=("ncls",))
    out = fwd(x, prep, ncls=ncls)
    jax.block_until_ready(out)
    assert out.shape == (2, 10), out.shape
    assert bool(jnp.all(jnp.isfinite(out)))
    print("KERNEL_OK")
</pallas_src>

<mosaic_0001>
module attributes {stable_mosaic.version = 11 : i64} {
  func.func @_conv_pool_relu_kernel(%arg0: i32, %arg1: memref<4x128x32xbf16, #tpu.memory_space<vmem>>, %arg2: memref<32x32xbf16, #tpu.memory_space<vmem>>, %arg3: memref<128x32xbf16, #tpu.memory_space<vmem>>) attributes {dimension_semantics = [#tpu.dimension_semantics<parallel>], iteration_bounds = array<i64: 1>, scalar_prefetch = 0 : i64, scratch_operands = 0 : i64, tpu.core_type = #tpu.core_type<tc>, window_params = [{transform_indices = @transform_0, window_bounds = array<i64: 4, 128, 32>}, {pipeline_mode = #tpu.pipeline_mode<synchronous>, transform_indices = @transform_1, window_bounds = array<i64: 32, 32>}, {transform_indices = @transform_2, window_bounds = array<i64: 128, 32>}]} {
    %c0 = arith.constant 0 : index
    %c0_0 = arith.constant 0 : index
    %0 = vector.load %arg2[%c0, %c0_0] : memref<32x32xbf16, #tpu.memory_space<vmem>>, vector<32x32xbf16>
    %c0_1 = arith.constant 0 : index
    %c0_2 = arith.constant 0 : index
    %c0_3 = arith.constant 0 : index
    %1 = vector.load %arg1[%c0_1, %c0_2, %c0_3] : memref<4x128x32xbf16, #tpu.memory_space<vmem>>, vector<1x128x32xbf16>
    %2 = vector.shape_cast %1 : vector<1x128x32xbf16> to vector<128x32xbf16>
    %cst = arith.constant dense<0.000000e+00> : vector<128x32xf32>
    %3 = tpu.matmul %2, %0, %cst {dimension_numbers = #tpu.dot_dimension_numbers<[1], [0], [0], [1], [0, 0, 1, 1], [], []>} : vector<128x32xbf16>, vector<32x32xbf16>, vector<128x32xf32> -> vector<128x32xf32>
    %c1 = arith.constant 1 : index
    %c0_4 = arith.constant 0 : index
    %c0_5 = arith.constant 0 : index
    %4 = vector.load %arg1[%c1, %c0_4, %c0_5] : memref<4x128x32xbf16, #tpu.memory_space<vmem>>, vector<1x128x32xbf16>
    %5 = vector.shape_cast %4 : vector<1x128x32xbf16> to vector<128x32xbf16>
    %cst_6 = arith.constant dense<0.000000e+00> : vector<128x32xf32>
    %6 = tpu.matmul %5, %0, %cst_6 {dimension_numbers = #tpu.dot_dimension_numbers<[1], [0], [0], [1], [0, 0, 1, 1], [], []>} : vector<128x32xbf16>, vector<32x32xbf16>, vector<128x32xf32> -> vector<128x32xf32>
    %7 = arith.maximumf %3, %6 : vector<128x32xf32>
    %c2 = arith.constant 2 : index
    %c0_7 = arith.constant 0 : index
    %c0_8 = arith.constant 0 : index
    %8 = vector.load %arg1[%c2, %c0_7, %c0_8] : memref<4x128x32xbf16, #tpu.memory_space<vmem>>, vector<1x128x32xbf16>
    %9 = vector.shape_cast %8 : vector<1x128x32xbf16> to vector<128x32xbf16>
    %cst_9 = arith.constant dense<0.000000e+00> : vector<128x32xf32>
    %10 = tpu.matmul %9, %0, %cst_9 {dimension_numbers = #tpu.dot_dimension_numbers<[1], [0], [0], [1], [0, 0, 1, 1], [], []>} : vector<128x32xbf16>, vector<32x32xbf16>, vector<128x32xf32> -> vector<128x32xf32>
    %11 = arith.maximumf %7, %10 : vector<128x32xf32>
    %c3 = arith.constant 3 : index
    %c0_10 = arith.constant 0 : index
    %c0_11 = arith.constant 0 : index
    %12 = vector.load %arg1[%c3, %c0_10, %c0_11] : memref<4x128x32xbf16, #tpu.memory_space<vmem>>, vector<1x128x32xbf16>
    %13 = vector.shape_cast %12 : vector<1x128x32xbf16> to vector<128x32xbf16>
    %cst_12 = arith.constant dense<0.000000e+00> : vector<128x32xf32>
    %14 = tpu.matmul %13, %0, %cst_12 {dimension_numbers = #tpu.dot_dimension_numbers<[1], [0], [0], [1], [0, 0, 1, 1], [], []>} : vector<128x32xbf16>, vector<32x32xbf16>, vector<128x32xf32> -> vector<128x32xf32>
    %15 = arith.maximumf %11, %14 : vector<128x32xf32>
    %cst_13 = arith.constant 0.000000e+00 : f32
    %16 = vector.broadcast %cst_13 : f32 to vector<128x32xf32>
    %17 = arith.maximumf %15, %16 : vector<128x32xf32>
    %18 = arith.truncf %17 : vector<128x32xf32> to vector<128x32xbf16>
    %c0_14 = arith.constant 0 : index
    %c0_15 = arith.constant 0 : index
    %19 = vector.load %arg3[%c0_14, %c0_15] : memref<128x32xbf16, #tpu.memory_space<vmem>>, vector<128x32xbf16>
    tpu.vector_store %arg3[%c0_14, %c0_15], %18 {strides = array<i32>} : memref<128x32xbf16, #tpu.memory_space<vmem>>, vector<128x32xbf16>,
    return
  }
  func.func @transform_0(%arg0: i32) -> (i32, i32, i32) {
    %c0_i32 = arith.constant 0 : i32
    %c0_i32_0 = arith.constant 0 : i32
    %c0_i32_1 = arith.constant 0 : i32
    return %c0_i32, %arg0, %c0_i32_0 : i32, i32, i32
  }
  func.func @transform_1(%arg0: i32) -> (i32, i32) {
    %c0_i32 = arith.constant 0 : i32
    %c0_i32_0 = arith.constant 0 : i32
    %c0_i32_1 = arith.constant 0 : i32
    return %c0_i32, %c0_i32_0 : i32, i32
  }
  func.func @transform_2(%arg0: i32) -> (i32, i32) {
    %c0_i32 = arith.constant 0 : i32
    %c0_i32_0 = arith.constant 0 : i32
    return %arg0, %c0_i32 : i32, i32
  }
}

module attributes {stable_mosaic.version = 11 : i64} {
  func.func @_conv_pool_relu_kernel(%arg0: i32, %arg1: memref<4x32x288xbf16, #tpu.memory_space<vmem>>, %arg2: memref<288x32xbf16, #tpu.memory_space<vmem>>, %arg3: memref<32x32xbf16, #tpu.memory_space<vmem>>) attributes {dimension_semantics = [#tpu.dimension_semantics<parallel>], iteration_bounds = array<i64: 1>, scalar_prefetch = 0 : i64, scratch_operands = 0 : i64, tpu.core_type = #tpu.core_type<tc>, window_params = [{transform_indices = @transform_0, window_bounds = array<i64: 4, 32, 288>}, {pipeline_mode = #tpu.pipeline_mode<synchronous>, transform_indices = @transform_1, window_bounds = array<i64: 288, 32>}, {transform_indices = @transform_2, window_bounds = array<i64: 32, 32>}]} {
    %c0 = arith.constant 0 : index
    %c0_0 = arith.constant 0 : index
    %0 = vector.load %arg2[%c0, %c0_0] : memref<288x32xbf16, #tpu.memory_space<vmem>>, vector<288x32xbf16>
    %c0_1 = arith.constant 0 : index
    %c0_2 = arith.constant 0 : index
    %c0_3 = arith.constant 0 : index
    %1 = vector.load %arg1[%c0_1, %c0_2, %c0_3] : memref<4x32x288xbf16, #tpu.memory_space<vmem>>, vector<1x32x288xbf16>
    %2 = vector.shape_cast %1 : vector<1x32x288xbf16> to vector<32x288xbf16>
    %cst = arith.constant dense<0.000000e+00> : vector<32x32xf32>
    %3 = tpu.matmul %2, %0, %cst {dimension_numbers = #tpu.dot_dimension_numbers<[1], [0], [0], [1], [0, 0, 1, 1], [], []>} : vector<32x288xbf16>, vector<288x32xbf16>, vector<32x32xf32> -> vector<32x32xf32>
    %c1 = arith.constant 1 : index
    %c0_4 = arith.constant 0 : index
    %c0_5 = arith.constant 0 : index
    %4 = vector.load %arg1[%c1, %c0_4, %c0_5] : memref<4x32x288xbf16, #tpu.memory_space<vmem>>, vector<1x32x288xbf16>
    %5 = vector.shape_cast %4 : vector<1x32x288xbf16> to vector<32x288xbf16>
    %cst_6 = arith.constant dense<0.000000e+00> : vector<32x32xf32>
    %6 = tpu.matmul %5, %0, %cst_6 {dimension_numbers = #tpu.dot_dimension_numbers<[1], [0], [0], [1], [0, 0, 1, 1], [], []>} : vector<32x288xbf16>, vector<288x32xbf16>, vector<32x32xf32> -> vector<32x32xf32>
    %7 = arith.maximumf %3, %6 : vector<32x32xf32>
    %c2 = arith.constant 2 : index
    %c0_7 = arith.constant 0 : index
    %c0_8 = arith.constant 0 : index
    %8 = vector.load %arg1[%c2, %c0_7, %c0_8] : memref<4x32x288xbf16, #tpu.memory_space<vmem>>, vector<1x32x288xbf16>
    %9 = vector.shape_cast %8 : vector<1x32x288xbf16> to vector<32x288xbf16>
    %cst_9 = arith.constant dense<0.000000e+00> : vector<32x32xf32>
    %10 = tpu.matmul %9, %0, %cst_9 {dimension_numbers = #tpu.dot_dimension_numbers<[1], [0], [0], [1], [0, 0, 1, 1], [], []>} : vector<32x288xbf16>, vector<288x32xbf16>, vector<32x32xf32> -> vector<32x32xf32>
    %11 = arith.maximumf %7, %10 : vector<32x32xf32>
    %c3 = arith.constant 3 : index
    %c0_10 = arith.constant 0 : index
    %c0_11 = arith.constant 0 : index
    %12 = vector.load %arg1[%c3, %c0_10, %c0_11] : memref<4x32x288xbf16, #tpu.memory_space<vmem>>, vector<1x32x288xbf16>
    %13 = vector.shape_cast %12 : vector<1x32x288xbf16> to vector<32x288xbf16>
    %cst_12 = arith.constant dense<0.000000e+00> : vector<32x32xf32>
    %14 = tpu.matmul %13, %0, %cst_12 {dimension_numbers = #tpu.dot_dimension_numbers<[1], [0], [0], [1], [0, 0, 1, 1], [], []>} : vector<32x288xbf16>, vector<288x32xbf16>, vector<32x32xf32> -> vector<32x32xf32>
    %15 = arith.maximumf %11, %14 : vector<32x32xf32>
    %cst_13 = arith.constant 0.000000e+00 : f32
    %16 = vector.broadcast %cst_13 : f32 to vector<32x32xf32>
    %17 = arith.maximumf %15, %16 : vector<32x32xf32>
    %18 = arith.truncf %17 : vector<32x32xf32> to vector<32x32xbf16>
    %c0_14 = arith.constant 0 : index
    %c0_15 = arith.constant 0 : index
    %19 = vector.load %arg3[%c0_14, %c0_15] : memref<32x32xbf16, #tpu.memory_space<vmem>>, vector<32x32xbf16>
    tpu.vector_store %arg3[%c0_14, %c0_15], %18 {strides = array<i32>} : memref<32x32xbf16, #tpu.memory_space<vmem>>, vector<32x32xbf16>,
    return
  }
  func.func @transform_0(%arg0: i32) -> (i32, i32, i32) {
    %c0_i32 = arith.constant 0 : i32
    %c0_i32_0 = arith.constant 0 : i32
    %c0_i32_1 = arith.constant 0 : i32
    return %c0_i32, %arg0, %c0_i32_0 : i32, i32, i32
  }
  func.func @transform_1(%arg0: i32) -> (i32, i32) {
    %c0_i32 = arith.constant 0 : i32
    %c0_i32_0 = arith.constant 0 : i32
    %c0_i32_1 = arith.constant 0 : i32
    return %c0_i32, %c0_i32_0 : i32, i32
  }
  func.func @transform_2(%arg0: i32) -> (i32, i32) {
    %c0_i32 = arith.constant 0 : i32
    %c0_i32_0 = arith.constant 0 : i32
    return %arg0, %c0_i32 : i32, i32
  }
}

module attributes {stable_mosaic.version = 11 : i64} {
  func.func @_conv_pool_relu_kernel(%arg0: i32, %arg1: memref<1x32x288xbf16, #tpu.memory_space<vmem>>, %arg2: memref<288x32xbf16, #tpu.memory_space<vmem>>, %arg3: memref<32x32xbf16, #tpu.memory_space<vmem>>) attributes {dimension_semantics = [#tpu.dimension_semantics<parallel>], iteration_bounds = array<i64: 1>, scalar_prefetch = 0 : i64, scratch_operands = 0 : i64, tpu.core_type = #tpu.core_type<tc>, window_params = [{transform_indices = @transform_0, window_bounds = array<i64: 1, 32, 288>}, {pipeline_mode = #tpu.pipeline_mode<synchronous>, transform_indices = @transform_1, window_bounds = array<i64: 288, 32>}, {transform_indices = @transform_2, window_bounds = array<i64: 32, 32>}]} {
    %c0 = arith.constant 0 : index
    %c0_0 = arith.constant 0 : index
    %0 = vector.load %arg2[%c0, %c0_0] : memref<288x32xbf16, #tpu.memory_space<vmem>>, vector<288x32xbf16>
    %c0_1 = arith.constant 0 : index
    %c0_2 = arith.constant 0 : index
    %c0_3 = arith.constant 0 : index
    %1 = vector.load %arg1[%c0_1, %c0_2, %c0_3] : memref<1x32x288xbf16, #tpu.memory_space<vmem>>, vector<1x32x288xbf16>
    %2 = vector.shape_cast %1 : vector<1x32x288xbf16> to vector<32x288xbf16>
    %cst = arith.constant dense<0.000000e+00> : vector<32x32xf32>
    %3 = tpu.matmul %2, %0, %cst {dimension_numbers = #tpu.dot_dimension_numbers<[1], [0], [0], [1], [0, 0, 1, 1], [], []>} : vector<32x288xbf16>, vector<288x32xbf16>, vector<32x32xf32> -> vector<32x32xf32>
    %cst_4 = arith.constant 0.000000e+00 : f32
    %4 = vector.broadcast %cst_4 : f32 to vector<32x32xf32>
    %5 = arith.maximumf %3, %4 : vector<32x32xf32>
    %6 = arith.truncf %5 : vector<32x32xf32> to vector<32x32xbf16>
    %c0_5 = arith.constant 0 : index
    %c0_6 = arith.constant 0 : index
    %7 = vector.load %arg3[%c0_5, %c0_6] : memref<32x32xbf16, #tpu.memory_space<vmem>>, vector<32x32xbf16>
    tpu.vector_store %arg3[%c0_5, %c0_6], %6 {strides = array<i32>} : memref<32x32xbf16, #tpu.memory_space<vmem>>, vector<32x32xbf16>,
    return
  }
  func.func @transform_0(%arg0: i32) -> (i32, i32, i32) {
    %c0_i32 = arith.constant 0 : i32
    %c0_i32_0 = arith.constant 0 : i32
    %c0_i32_1 = arith.constant 0 : i32
    return %c0_i32, %arg0, %c0_i32_0 : i32, i32, i32
  }
  func.func @transform_1(%arg0: i32) -> (i32, i32) {
    %c0_i32 = arith.constant 0 : i32
    %c0_i32_0 = arith.constant 0 : i32
    %c0_i32_1 = arith.constant 0 : i32
    return %c0_i32, %c0_i32_0 : i32, i32
  }
  func.func @transform_2(%arg0: i32) -> (i32, i32) {
    %c0_i32 = arith.constant 0 : i32
    %c0_i32_0 = arith.constant 0 : i32
    return %arg0, %c0_i32 : i32, i32
  }
}

module attributes {stable_mosaic.version = 11 : i64} {
  func.func @_mlp_kernel(%arg0: memref<2x512xbf16, #tpu.memory_space<vmem>>, %arg1: memref<512x1024xbf16, #tpu.memory_space<vmem>>, %arg2: memref<1x1024xf32, #tpu.memory_space<vmem>>, %arg3: memref<1024x128xbf16, #tpu.memory_space<vmem>>, %arg4: memref<1x128xf32, #tpu.memory_space<vmem>>, %arg5: memref<2x128xf32, #tpu.memory_space<vmem>>) attributes {dimension_semantics = [], scalar_prefetch = 0 : i64, scratch_operands = 0 : i64, tpu.core_type = #tpu.core_type<tc>} {
    %c0 = arith.constant 0 : index
    %c0_0 = arith.constant 0 : index
    %0 = vector.load %arg0[%c0, %c0_0] : memref<2x512xbf16, #tpu.memory_space<vmem>>, vector<2x512xbf16>
    %c0_1 = arith.constant 0 : index
    %c0_2 = arith.constant 0 : index
    %1 = vector.load %arg1[%c0_1, %c0_2] : memref<512x1024xbf16, #tpu.memory_space<vmem>>, vector<512x1024xbf16>
    %cst = arith.constant dense<0.000000e+00> : vector<2x1024xf32>
    %2 = tpu.matmul %0, %1, %cst {dimension_numbers = #tpu.dot_dimension_numbers<[1], [0], [0], [1], [0, 0, 1, 1], [], []>} : vector<2x512xbf16>, vector<512x1024xbf16>, vector<2x1024xf32> -> vector<2x1024xf32>
    %c0_3 = arith.constant 0 : index
    %c0_4 = arith.constant 0 : index
    %3 = vector.load %arg2[%c0_3, %c0_4] : memref<1x1024xf32, #tpu.memory_space<vmem>>, vector<1x1024xf32>
    %4 = vector.broadcast %3 : vector<1x1024xf32> to vector<2x1024xf32>
    %5 = arith.addf %2, %4 : vector<2x1024xf32>
    %6 = arith.truncf %5 : vector<2x1024xf32> to vector<2x1024xbf16>
    %c0_5 = arith.constant 0 : index
    %c0_6 = arith.constant 0 : index
    %7 = vector.load %arg3[%c0_5, %c0_6] : memref<1024x128xbf16, #tpu.memory_space<vmem>>, vector<1024x128xbf16>
    %cst_7 = arith.constant dense<0.000000e+00> : vector<2x128xf32>
    %8 = tpu.matmul %6, %7, %cst_7 {dimension_numbers = #tpu.dot_dimension_numbers<[1], [0], [0], [1], [0, 0, 1, 1], [], []>} : vector<2x1024xbf16>, vector<1024x128xbf16>, vector<2x128xf32> -> vector<2x128xf32>
    %c0_8 = arith.constant 0 : index
    %c0_9 = arith.constant 0 : index
    %9 = vector.load %arg4[%c0_8, %c0_9] : memref<1x128xf32, #tpu.memory_space<vmem>>, vector<1x128xf32>
    %10 = vector.broadcast %9 : vector<1x128xf32> to vector<2x128xf32>
    %11 = arith.addf %8, %10 : vector<2x128xf32>
    %c0_10 = arith.constant 0 : index
    %c0_11 = arith.constant 0 : index
    %12 = vector.load %arg5[%c0_10, %c0_11] : memref<2x128xf32, #tpu.memory_space<vmem>>, vector<2x128xf32>
    tpu.vector_store %arg5[%c0_10, %c0_11], %11 {strides = array<i32>} : memref<2x128xf32, #tpu.memory_space<vmem>>, vector<2x128xf32>,
    return
  }
}

</mosaic_0001>

<bundles_post_ra>
// kernel: base_svhnet_forward.4
= control target key start
LH: loop header
LB: loop body
LE: loop exit
PB: predicated region body
PF: predicated region fallthrough
CT: control target
= control target key end

     0   :  { %vm84_vm0 = vcmask 261120   ;;  %vm868_vm1 = vcmask 257024   ;;  %s1507_s1 = inlined_call_operand.vmem [shape: bf16[32,32], index: 1, kind: input, shape index: {}]   ;;  %s1508_s0 = inlined_call_operand.vmem [shape: bf16[4,128,32], index: 0, kind: input, shape index: {}]   ;;  %s1509_s2 = inlined_call_operand.vmem [shape: bf16[128,32], index: 2, kind: output, shape index: {}]  }
   0x1   :  { %v1155_v0 = vld [vmem:[%s1507_s1] sm:$0xff]   ;;  %v1156_v1 = vld [vmem:[%s1507_s1 + $0x8] sm:$0xff]   ;;  %v1161_v6 = vld [vmem:[%s1508_s0 + $0x10] sm:$0xff]  }
   0x2   :  { %1075 = vmatprep.subr.bf16.mxu0 %v1155_v0  ;;  %1095 = vmatprep.subr.bf16.mxu1 %v1155_v0  ;;  %v1157_v2 = vld [vmem:[%s1508_s0] sm:$0xff]   ;;  %v1159_v4 = vld [vmem:[%s1508_s0 + $0x8] sm:$0xff]   ;;  %v1162_v7 = vld [vmem:[%s1508_s0 + $0x50] sm:$0xff]  }
   0x3   :  { %1076 = vmatpush3.bf16.msra.mxu0 %v1155_v0  ;;  %1096 = vmatpush3.bf16.msra.mxu1 %v1155_v0  ;;  %v1158_v3 = vld [vmem:[%s1508_s0 + $0x40] sm:$0xff]   ;;  %v1160_v5 = vld [vmem:[%s1508_s0 + $0x48] sm:$0xff]   ;;  %v1163_v8 = vld [vmem:[%s1508_s0 + $0x18] sm:$0xff]  }
   0x4   :  { %1077 = vmatprep.subr.bf16.mxu0 %v1156_v1  ;;  %1097 = vmatprep.subr.bf16.mxu1 %v1156_v1  ;;  %v1164_v9 = vld [vmem:[%s1508_s0 + $0x58] sm:$0xff]   ;;  %v1165_v10 = vld [vmem:[%s1508_s0 + $0x20] sm:$0xff]   ;;  %v1167_v12 = vld [vmem:[%s1508_s0 + $0x28] sm:$0xff]  }
   0x5   :  { %1079 = vmatprep.mubr.msk.bf16.mxu0 %vm84_vm0, %v1157_v2  ;;  %1099 = vmatprep.mubr.msk.bf16.mxu1 %vm84_vm0, %v1158_v3  ;;  %v1166_v11 = vld [vmem:[%s1508_s0 + $0x60] sm:$0xff]   ;;  %v1168_v13 = vld [vmem:[%s1508_s0 + $0x68] sm:$0xff]   ;;  %v1169_v14 = vld [vmem:[%s1508_s0 + $0x30] sm:$0xff]  }
   0x6   :  { %v1170_v15 = vld [vmem:[%s1508_s0 + $0x70] sm:$0xff]   ;;  %v1171_v16 = vld [vmem:[%s1508_s0 + $0x38] sm:$0xff]   ;;  %v1173_v18 = vld [vmem:[%s1508_s0 + $0x80] sm:$0xff]  }
   0x7   :  { %1078 = vmatpush3.bf16.msra.mxu0 %v1156_v1  ;;  %1098 = vmatpush3.bf16.msra.mxu1 %v1156_v1  ;;  %v1172_v17 = vld [vmem:[%s1508_s0 + $0x78] sm:$0xff]   ;;  %v1174_v19 = vld [vmem:[%s1508_s0 + $0xc0] sm:$0xff]   ;;  %v1175_v20 = vld [vmem:[%s1508_s0 + $0x88] sm:$0xff]  }
   0x8   :  { %1115 = vmatprep.subr.bf16.mxu0 %v1155_v0  ;;  %1135 = vmatprep.subr.bf16.mxu1 %v1155_v0  ;;  %v1176_v21 = vld [vmem:[%s1508_s0 + $0xc8] sm:$0xff]   ;;  %v1177_v22 = vld [vmem:[%s1508_s0 + $0x90] sm:$0xff]   ;;  %v1179_v24 = vld [vmem:[%s1508_s0 + $0x98] sm:$0xff]  }
   0x9   :  { %v1178_v23 = vld [vmem:[%s1508_s0 + $0xd0] sm:$0xff]   ;;  %v1180_v25 = vld [vmem:[%s1508_s0 + $0xd8] sm:$0xff]   ;;  %v1181_v26 = vld [vmem:[%s1508_s0 + $0xa0] sm:$0xff]  }
   0xa   :  { %1080 = vmatmul.mubr.msk.bf16.vlgmr.msra.gmra.mrb[0].mxu0 %vm84_vm0, %v1159_v4  ;;  %1100 = vmatmul.mubr.msk.bf16.vlgmr.msra.gmra.mrb[0].mxu1 %vm84_vm0, %v1160_v5  ;;  %v1182_v27 = vld [vmem:[%s1508_s0 + $0xe0] sm:$0xff]   ;;  %v1183_v28 = vld [vmem:[%s1508_s0 + $0xa8] sm:$0xff]   ;;  %v1185_v30 = vld [vmem:[%s1508_s0 + $0xb0] sm:$0xff]  }
   0xb   :  { %1116 = vmatpush3.bf16.msra.mxu0 %v1155_v0  ;;  %1136 = vmatpush3.bf16.msra.mxu1 %v1155_v0  ;;  %v1184_v29 = vld [vmem:[%s1508_s0 + $0xe8] sm:$0xff]   ;;  %v1186_v31 = vld [vmem:[%s1508_s0 + $0xf0] sm:$0xff]   ;;  %v1187_v32 = vld [vmem:[%s1508_s0 + $0xb8] sm:$0xff]  }
   0xc   :  { %1083 = vmatprep.mubr.msk.bf16.mxu0 %vm84_vm0, %v1161_v6  ;;  %1103 = vmatprep.mubr.msk.bf16.mxu1 %vm84_vm0, %v1162_v7  ;;  %v1188_v33 = vld [vmem:[%s1508_s0 + $0xf8] sm:$0xff]  }
   0xd   :  { %1117 = vmatprep.subr.bf16.mxu0 %v1156_v1  ;;  %1137 = vmatprep.subr.bf16.mxu1 %v1156_v1 }
   0xf   :  { %1118 = vmatpush3.bf16.msra.mxu0 %v1156_v1  ;;  %1138 = vmatpush3.bf16.msra.mxu1 %v1156_v1 }
  0x12   :  { %1084 = vmatmul.mubr.msk.bf16.gmra.mrb[4].mxu0 %vm84_vm0, %v1163_v8  ;;  %1104 = vmatmul.mubr.msk.bf16.gmra.mrb[4].mxu1 %vm84_vm0, %v1164_v9 }
  0x13   :  { %1087 = vmatprep.mubr.msk.bf16.mxu0 %vm84_vm0, %v1165_v10  ;;  %1107 = vmatprep.mubr.msk.bf16.mxu1 %vm84_vm0, %v1166_v11 }
  0x1a   :  { %1088 = vmatmul.mubr.msk.bf16.gmra.mrb[8].mxu0 %vm84_vm0, %v1167_v12  ;;  %1108 = vmatmul.mubr.msk.bf16.gmra.mrb[8].mxu1 %vm84_vm0, %v1168_v13 }
  0x1b   :  { %1091 = vmatprep.mubr.msk.bf16.mxu0 %vm84_vm0, %v1169_v14  ;;  %1111 = vmatprep.mubr.msk.bf16.mxu1 %vm84_vm0, %v1170_v15 }
  0x22   :  { %1092 = vmatmul.mubr.msk.bf16.gmra.mrb[12].mxu0 %vm84_vm0, %v1171_v16  ;;  %1112 = vmatmul.mubr.msk.bf16.gmra.mrb[12].mxu1 %vm84_vm0, %v1172_v17 }
  0x23   :  { %1119 = vmatprep.mubr.msk.bf16.mxu0 %vm84_vm0, %v1173_v18  ;;  %1139 = vmatprep.mubr.msk.bf16.mxu1 %vm84_vm0, %v1174_v19 }
  0x2a   :  { %1120 = vmatmul.mubr.msk.bf16.vlgmr.msra.gmra.mrb[16].mxu0 %vm84_vm0, %v1175_v20  ;;  %1140 = vmatmul.mubr.msk.bf16.vlgmr.msra.gmra.mrb[16].mxu1 %vm84_vm0, %v1176_v21 }
  0x2b   :  { %1123 = vmatprep.mubr.msk.bf16.mxu0 %vm84_vm0, %v1177_v22  ;;  %1143 = vmatprep.mubr.msk.bf16.mxu1 %vm84_vm0, %v1178_v23 }
  0x32   :  { %1124 = vmatmul.mubr.msk.bf16.gmra.mrb[20].mxu0 %vm84_vm0, %v1179_v24  ;;  %1144 = vmatmul.mubr.msk.bf16.gmra.mrb[20].mxu1 %vm84_vm0, %v1180_v25 }
  0x33   :  { %1127 = vmatprep.mubr.msk.bf16.mxu0 %vm84_vm0, %v1181_v26  ;;  %1147 = vmatprep.mubr.msk.bf16.mxu1 %vm84_vm0, %v1182_v27 }
  0x3a   :  { %1128 = vmatmul.mubr.msk.bf16.gmra.mrb[24].mxu0 %vm84_vm0, %v1183_v28  ;;  %1148 = vmatmul.mubr.msk.bf16.gmra.mrb[24].mxu1 %vm84_vm0, %v1184_v29 }
  0x3b   :  { %1131 = vmatprep.mubr.msk.bf16.mxu0 %vm84_vm0, %v1185_v30  ;;  %1151 = vmatprep.mubr.msk.bf16.mxu1 %vm84_vm0, %v1186_v31 }
  0x42   :  { %1132 = vmatmul.mubr.msk.bf16.gmra.mrb[28].mxu0 %vm84_vm0, %v1187_v32  ;;  %1152 = vmatmul.mubr.msk.bf16.gmra.mrb[28].mxu1 %vm84_vm0, %v1188_v33 }
  0xdd   :  { %v1081_v34 = vpop.f32.mrb[0].mxu0  ;;  %v1101_v35 = vpop.f32.mrb[0].mxu1 }
  0xde   :  { %v386_v36 = vmax.f32 %v1081_v34, %v1101_v35  ;;  %v143_v37 = vpop.f32.mrb[1].mxu0  ;;  %v321_v38 = vpop.f32.mrb[1].mxu1 }
  0xdf   :  { %v384_v39 = vmax.f32 %v143_v37, %v321_v38  ;;  %v1082_v40 = vpop.f32.mrb[2].mxu0  ;;  %v1102_v41 = vpop.f32.mrb[2].mxu1 }
  0xe0   :  { %v387_v42 = vmax.f32 %v1082_v40, %v1102_v41  ;;  %v146_v43 = vpop.f32.mrb[3].mxu0  ;;  %v324_v44 = vpop.f32.mrb[3].mxu1 }
  0xe1   :  { %v385_v45 = vmax.f32 %v146_v43, %v324_v44 }
  0xe5   :  { %v1338_v46 = vpop.f32.mrb[4].mxu0  ;;  %v1340_v47 = vpop.f32.mrb[4].mxu1 }
  0xe6   :  { %v390_v48 = vmax.f32 %v1338_v46, %v1340_v47  ;;  %v1344_v49 = vpop.f32.mrb[5].mxu0  ;;  %v1346_v50 = vpop.f32.mrb[5].mxu1 }
  0xe7   :  { %v388_v51 = vmax.f32 %v1344_v49, %v1346_v50  ;;  %v1350_v52 = vpop.f32.mrb[6].mxu0  ;;  %v1352_v53 = vpop.f32.mrb[6].mxu1 }
  0xe8   :  { %v391_v54 = vmax.f32 %v1350_v52, %v1352_v53  ;;  %v1356_v55 = vpop.f32.mrb[7].mxu0  ;;  %v1358_v56 = vpop.f32.mrb[7].mxu1 }
  0xe9   :  { %v389_v57 = vmax.f32 %v1356_v55, %v1358_v56 }
  0xed   :  { %v1362_v58 = vpop.f32.mrb[8].mxu0  ;;  %v1364_v59 = vpop.f32.mrb[8].mxu1 }
  0xee   :  { %v394_v60 = vmax.f32 %v1362_v58, %v1364_v59  ;;  %v1368_v61 = vpop.f32.mrb[9].mxu0  ;;  %v1370_v62 = vpop.f32.mrb[9].mxu1 }
  0xef   :  { %v392_v63 = vmax.f32 %v1368_v61, %v1370_v62  ;;  %v1374_v0 = vpop.f32.mrb[10].mxu0  ;;  %v1376_v1 = vpop.f32.mrb[10].mxu1 }
  0xf0   :  { %v395_v2 = vmax.f32 %v1374_v0, %v1376_v1  ;;  %v1380_v3 = vpop.f32.mrb[11].mxu0  ;;  %v1382_v4 = vpop.f32.mrb[11].mxu1 }
  0xf1   :  { %v393_v5 = vmax.f32 %v1380_v3, %v1382_v4 }
  0xf5   :  { %v1386_v6 = vpop.f32.mrb[12].mxu0  ;;  %v1388_v7 = vpop.f32.mrb[12].mxu1 }
  0xf6   :  { %v398_v8 = vmax.f32 %v1386_v6, %v1388_v7  ;;  %v1392_v9 = vpop.f32.mrb[13].mxu0  ;;  %v1394_v10 = vpop.f32.mrb[13].mxu1 }
  0xf7   :  { %v396_v11 = vmax.f32 %v1392_v9, %v1394_v10  ;;  %v1398_v12 = vpop.f32.mrb[14].mxu0  ;;  %v1400_v13 = vpop.f32.mrb[14].mxu1 }
  0xf8   :  { %v399_v14 = vmax.f32 %v1398_v12, %v1400_v13  ;;  %v1404_v15 = vpop.f32.mrb[15].mxu0  ;;  %v1406_v16 = vpop.f32.mrb[15].mxu1 }
  0xf9   :  { %v397_v17 = vmax.f32 %v1404_v15, %v1406_v16 }
  0xfd   :  { %v1121_v18 = vpop.f32.mrb[16].mxu0  ;;  %v1141_v19 = vpop.f32.mrb[16].mxu1 }
  0xfe   :  { %v580_v20 = vmax.f32 %v386_v36, %v1121_v18  ;;  %v515_v21 = vpop.f32.mrb[17].mxu0  ;;  %v709_v22 = vpop.f32.mrb[17].mxu1 }
  0xff   :  { %v578_v23 = vmax.f32 %v384_v39, %v515_v21  ;;  %v1122_v24 = vpop.f32.mrb[18].mxu0  ;;  %v1142_v25 = vpop.f32.mrb[18].mxu1 }
 0x100   :  { %v774_v26 = vmax.f32 %v580_v20, %v1141_v19  ;;  %v581_v27 = vmax.f32 %v387_v42, %v1122_v24  ;;  %v518_v28 = vpop.f32.mrb[19].mxu0  ;;  %v712_v29 = vpop.f32.mrb[19].mxu1 }
 0x101   :  { %v772_v30 = vmax.f32 %v578_v23, %v709_v22  ;;  %v579_v31 = vmax.f32 %v385_v45, %v518_v28 }
 0x102   :  { %v790_v32 = vmax.f32 %v774_v26, 0.0  ;;  %v775_v33 = vmax.f32 %v581_v27, %v1142_v25 }
 0x103   :  { %v788_v34 = vmax.f32 %v772_v30, 0.0  ;;  %v773_v35 = vmax.f32 %v579_v31, %v712_v29 }
 0x104   :  { %v1021_v37 = vpack.c.bf16 %v790_v32, %v790_v32  ;;  %v791_v38 = vmax.f32 %v775_v33, 0.0 }
 0x105   :  { %v1019_v40 = vpack.c.bf16 %v788_v34, %v788_v34  ;;  %v789_v36 = vmax.f32 %v773_v35, 0.0  ;;  %v1125_v41 = vpop.f32.mrb[20].mxu0  ;;  %v1145_v43 = vpop.f32.mrb[20].mxu1 }
 0x106   :  { %871 = vst.msk [vmem:[%s1509_s2 + $0x8] sm:$0xf] %vm868_vm1, %v1021_v37  ;;  %v1022_v39 = vpack.c.bf16 %v791_v38, %v791_v38  ;;  %v584_v42 = vmax.f32 %v390_v48, %v1125_v41  ;;  %v531_v44 = vpop.f32.mrb[21].mxu0  ;;  %v725_v45 = vpop.f32.mrb[21].mxu1 }
 0x107   :  { %869 = vst.msk [vmem:[%s1509_s2] sm:$0xf] %vm868_vm1, %v1019_v40  ;;  %v1020_v46 = vpack.c.bf16 %v789_v36, %v789_v36  ;;  %v582_v47 = vmax.f32 %v388_v51, %v531_v44  ;;  %v1126_v18 = vpop.f32.mrb[22].mxu0  ;;  %v1146_v19 = vpop.f32.mrb[22].mxu1 }
 0x108   :  { %872 = vst.msk [vmem:[%s1509_s2 + $0xc] sm:$0xf] %vm868_vm1, %v1022_v39  ;;  %v778_v48 = vmax.f32 %v584_v42, %v1145_v43  ;;  %v585_v20 = vmax.f32 %v391_v54, %v1126_v18  ;;  %v534_v21 = vpop.f32.mrb[23].mxu0  ;;  %v728_v22 = vpop.f32.mrb[23].mxu1 }
 0x109   :  { %870 = vst.msk [vmem:[%s1509_s2 + $0x4] sm:$0xf] %vm868_vm1, %v1020_v46  ;;  %v776_v49 = vmax.f32 %v582_v47, %v725_v45  ;;  %v583_v50 = vmax.f32 %v389_v57, %v534_v21 }
 0x10a   :  { %v794_v51 = vmax.f32 %v778_v48, 0.0  ;;  %v779_v23 = vmax.f32 %v585_v20, %v1146_v19 }
 0x10b   :  { %v792_v24 = vmax.f32 %v776_v49, 0.0  ;;  %v777_v25 = vmax.f32 %v583_v50, %v728_v22 }
 0x10c   :  { %v1025_v26 = vpack.c.bf16 %v794_v51, %v794_v51  ;;  %v795_v27 = vmax.f32 %v779_v23, 0.0 }
 0x10d   :  { %v1023_v52 = vpack.c.bf16 %v792_v24, %v792_v24  ;;  %v793_v53 = vmax.f32 %v777_v25, 0.0  ;;  %v1129_v54 = vpop.f32.mrb[24].mxu0  ;;  %v1149_v28 = vpop.f32.mrb[24].mxu1 }
 0x10e   :  { %875 = vst.msk [vmem:[%s1509_s2 + $0x18] sm:$0xf] %vm868_vm1, %v1025_v26  ;;  %v1026_v29 = vpack.c.bf16 %v795_v27, %v795_v27  ;;  %v588_v55 = vmax.f32 %v394_v60, %v1129_v54  ;;  %v547_v56 = vpop.f32.mrb[25].mxu0  ;;  %v741_v57 = vpop.f32.mrb[25].mxu1 }
 0x10f   :  { %873 = vst.msk [vmem:[%s1509_s2 + $0x10] sm:$0xf] %vm868_vm1, %v1023_v52  ;;  %v1024_v30 = vpack.c.bf16 %v793_v53, %v793_v53  ;;  %v586_v31 = vmax.f32 %v392_v63, %v547_v56  ;;  %v1130_v32 = vpop.f32.mrb[26].mxu0  ;;  %v1150_v33 = vpop.f32.mrb[26].mxu1 }
 0x110   :  { %876 = vst.msk [vmem:[%s1509_s2 + $0x1c] sm:$0xf] %vm868_vm1, %v1026_v29  ;;  %v782_v58 = vmax.f32 %v588_v55, %v1149_v28  ;;  %v589_v59 = vmax.f32 %v395_v2, %v1130_v32  ;;  %v550_v60 = vpop.f32.mrb[27].mxu0  ;;  %v744_v34 = vpop.f32.mrb[27].mxu1 }
 0x111   :  { %874 = vst.msk [vmem:[%s1509_s2 + $0x14] sm:$0xf] %vm868_vm1, %v1024_v30  ;;  %v780_v61 = vmax.f32 %v586_v31, %v741_v57  ;;  %v587_v62 = vmax.f32 %v393_v5, %v550_v60 }
 0x112   :  { %v798_v63 = vmax.f32 %v782_v58, 0.0  ;;  %v783_v35 = vmax.f32 %v589_v59, %v1150_v33 }
 0x113   :  { %v796_v37 = vmax.f32 %v780_v61, 0.0  ;;  %v781_v38 = vmax.f32 %v587_v62, %v744_v34 }
 0x114   :  { %v1029_v40 = vpack.c.bf16 %v798_v63, %v798_v63  ;;  %v799_v36 = vmax.f32 %v783_v35, 0.0 }
 0x115   :  { %v1027_v0 = vpack.c.bf16 %v796_v37, %v796_v37  ;;  %v797_v1 = vmax.f32 %v781_v38, 0.0  ;;  %v1133_v2 = vpop.f32.mrb[28].mxu0  ;;  %v1153_v41 = vpop.f32.mrb[28].mxu1 }
 0x116   :  { %879 = vst.msk [vmem:[%s1509_s2 + $0x28] sm:$0xf] %vm868_vm1, %v1029_v40  ;;  %v1030_v43 = vpack.c.bf16 %v799_v36, %v799_v36  ;;  %v592_v3 = vmax.f32 %v398_v8, %v1133_v2  ;;  %v563_v4 = vpop.f32.mrb[29].mxu0  ;;  %v757_v5 = vpop.f32.mrb[29].mxu1 }
 0x117   :  { %877 = vst.msk [vmem:[%s1509_s2 + $0x20] sm:$0xf] %vm868_vm1, %v1027_v0  ;;  %v1028_v39 = vpack.c.bf16 %v797_v1, %v797_v1  ;;  %v590_v42 = vmax.f32 %v396_v11, %v563_v4  ;;  %v1134_v44 = vpop.f32.mrb[30].mxu0  ;;  %v1154_v45 = vpop.f32.mrb[30].mxu1 }
 0x118   :  { %880 = vst.msk [vmem:[%s1509_s2 + $0x2c] sm:$0xf] %vm868_vm1, %v1030_v43  ;;  %v786_v6 = vmax.f32 %v592_v3, %v1153_v41  ;;  %v593_v7 = vmax.f32 %v399_v14, %v1134_v44  ;;  %v566_v8 = vpop.f32.mrb[31].mxu0  ;;  %v760_v46 = vpop.f32.mrb[31].mxu1 }
 0x119   :  { %878 = vst.msk [vmem:[%s1509_s2 + $0x24] sm:$0xf] %vm868_vm1, %v1028_v39  ;;  %v784_v9 = vmax.f32 %v590_v42, %v757_v5  ;;  %v591_v10 = vmax.f32 %v397_v17, %v566_v8 }
 0x11a   :  { %v802_v11 = vmax.f32 %v786_v6, 0.0  ;;  %v787_v47 = vmax.f32 %v593_v7, %v1154_v45 }
 0x11b   :  { %v800_v18 = vmax.f32 %v784_v9, 0.0  ;;  %v785_v19 = vmax.f32 %v591_v10, %v760_v46 }
 0x11c   :  { %v1033_v48 = vpack.c.bf16 %v802_v11, %v802_v11  ;;  %v803_v20 = vmax.f32 %v787_v47, 0.0 }
 0x11d   :  { %v1031_v12 = vpack.c.bf16 %v800_v18, %v800_v18  ;;  %v801_v13 = vmax.f32 %v785_v19, 0.0 }
 0x11e   :  { %883 = vst.msk [vmem:[%s1509_s2 + $0x38] sm:$0xf] %vm868_vm1, %v1033_v48  ;;  %v1034_v14 = vpack.c.bf16 %v803_v20, %v803_v20 }
 0x11f   :  { %881 = vst.msk [vmem:[%s1509_s2 + $0x30] sm:$0xf] %vm868_vm1, %v1031_v12  ;;  %v1032_v15 = vpack.c.bf16 %v801_v13, %v801_v13 }
 0x120   :  { %884 = vst.msk [vmem:[%s1509_s2 + $0x3c] sm:$0xf] %vm868_vm1, %v1034_v14 }
 0x121   :  { %882 = vst.msk [vmem:[%s1509_s2 + $0x34] sm:$0xf] %vm868_vm1, %v1032_v15 }

// kernel: base_svhnet_forward.5
= control target key start
LH: loop header
LB: loop body
LE: loop exit
PB: predicated region body
PF: predicated region fallthrough
CT: control target
= control target key end

     0   :  { %vm194_vm0 = vcmask 261120   ;;  %vm760_vm1 = vcmask 257024   ;;  %s1342_s1 = inlined_call_operand.vmem [shape: bf16[288,32], index: 1, kind: input, shape index: {}]   ;;  %s1343_s0 = inlined_call_operand.vmem [shape: bf16[4,32,288], index: 0, kind: input, shape index: {}]   ;;  %s1344_s2 = inlined_call_operand.vmem [shape: bf16[32,32], index: 2, kind: output, shape index: {}]  }
   0x1   :  { %v1079_v0 = vld [vmem:[%s1342_s1 + $0x40] sm:$0xff]   ;;  %v1096_v3 = vld [vmem:[%s1342_s1 + $0x48] sm:$0xff]   ;;  %v1115_v6 = vld [vmem:[%s1342_s1 + $0x50] sm:$0xff]  }
   0x2   :  { %v1084_v1 = vld [vmem:[%s1342_s1 + $0x80] sm:$0xff]   ;;  %851 = vmatprep.subr.bf16.mxu0 %v1079_v0  ;;  %v1103_v4 = vld [vmem:[%s1342_s1 + $0x88] sm:$0xff]   ;;  %v1125_v8 = vld [vmem:[%s1342_s1 + $0x10] sm:$0xff]  }
   0x3   :  { %v1090_v2 = vld [vmem:[%s1342_s1] sm:$0xff]   ;;  %979 = vmatprep.subr.bf16.mxu1 %v1084_v1  ;;  %v1109_v5 = vld [vmem:[%s1342_s1 + $0x8] sm:$0xff]   ;;  %v1136_v10 = vld [vmem:[%s1342_s1 + $0x58] sm:$0xff]  }
   0x4   :  { %852 = vmatpush3.bf16.msra.mxu0 %v1090_v2  ;;  %980 = vmatpush3.bf16.msra.mxu1 %v1084_v1  ;;  %v1018_v7 = vld [vmem:[%s1343_s0 + $0x8] ss:$12 sps:$4 sm:$0xff]   ;;  %v1020_v9 = vld [vmem:[%s1343_s0 + $0x20] ss:$12 sps:$4 sm:$0xff]   ;;  %v1144_v11 = vld [vmem:[%s1342_s1 + $0x18] sm:$0xff]  }
   0x5   :  { %853 = vmatprep.subr.bf16.mxu0 %v1096_v3  ;;  %981 = vmatprep.subr.bf16.mxu1 %v1103_v4  ;;  %v1151_v12 = vld [vmem:[%s1342_s1 + $0x60] sm:$0xff]   ;;  %v1165_v14 = vld [vmem:[%s1342_s1 + $0x68] sm:$0xff]   ;;  %v1177_v16 = vld [vmem:[%s1342_s1 + $0x70] sm:$0xff]  }
   0x6   :  { %983 = vmatprep.mubr.msk.bf16.mxu1 %vm194_vm0, %v1018_v7  ;;  %v1158_v13 = vld [vmem:[%s1342_s1 + $0x20] sm:$0xff]   ;;  %v1170_v15 = vld [vmem:[%s1342_s1 + $0x28] sm:$0xff]   ;;  %v1192_v19 = vld [vmem:[%s1342_s1 + $0x30] sm:$0xff]  }
   0x7   :  { %v1033_v17 = vld [vmem:[%s1343_s0 + $0x4] ss:$12 sps:$4 sm:$0xff]   ;;  %v1038_v18 = vld [vmem:[%s1343_s0 + $0x34] ss:$12 sps:$4 sm:$0xff]   ;;  %v1199_v20 = vld [vmem:[%s1342_s1 + $0x78] sm:$0xff]  }
   0x8   :  { %854 = vmatpush3.bf16.msra.mxu0 %v1109_v5  ;;  %982 = vmatpush3.bf16.msra.mxu1 %v1103_v4  ;;  %v1206_v21 = vld [vmem:[%s1342_s1 + $0x38] sm:$0xff]   ;;  %v1031_v22 = vld [vmem:[%s1343_s0] ss:$12 sps:$4 sm:$0xff]   ;;  %v1043_v28 = vld [vmem:[%s1343_s0 + $0x48] ss:$12 sps:$4 sm:$0xff]  }
   0x9   :  { %855 = vmatprep.subr.bf16.mxu0 %v1115_v6  ;;  %883 = vmatprep.subr.bf16.mxu1 %v1079_v0  ;;  %v1034_v23 = vld [vmem:[%s1343_s0 + $0x1c] ss:$12 sps:$4 sm:$0xff]   ;;  %v1039_v25 = vld [vmem:[%s1343_s0 + $0x18] ss:$12 sps:$4 sm:$0xff]   ;;  %v1046_v32 = vld [vmem:[%s1343_s0 + $0x80] ss:$12 sps:$4 sm:$0xff]  }
   0xa   :  { %233 = vmatprep.mubr.bf16.mxu0 %v1033_v17  ;;  %v1036_v24 = vld [vmem:[%s1343_s0 + $0x30] ss:$12 sps:$4 sm:$0xff]   ;;  %v1040_v26 = vld [vmem:[%s1343_s0 + $0x4c] ss:$12 sps:$4 sm:$0xff]   ;;  %v1045_v30 = vld [vmem:[%s1343_s0 + $0x68] ss:$12 sps:$4 sm:$0xff]  }
   0xb   :  { %984 = vmatmul.mubr.msk.bf16.vlgmr.msra.gmra.mrb[0].mxu1 %vm194_vm0, %v1020_v9  ;;  %v1042_v27 = vld [vmem:[%s1343_s0 + $0x38] ss:$12 sps:$4 sm:$0xff]   ;;  %v1044_v29 = vld [vmem:[%s1343_s0 + $0x50] ss:$12 sps:$4 sm:$0xff]   ;;  %v1055_v33 = vld [vmem:[%s1343_s0 + $0x94] ss:$12 sps:$4 sm:$0xff]  }
   0xc   :  { %856 = vmatpush3.bf16.msra.mxu0 %v1125_v8  ;;  %884 = vmatpush3.bf16.msra.mxu1 %v1090_v2  ;;  %v1049_v31 = vld [vmem:[%s1343_s0 + $0x64] ss:$12 sps:$4 sm:$0xff]   ;;  %v1047_v34 = vld [vmem:[%s1343_s0 + $0x60] ss:$12 sps:$4 sm:$0xff]   ;;  %v1050_v35 = vld [vmem:[%s1343_s0 + $0x7c] ss:$12 sps:$4 sm:$0xff]  }
   0xd   :  { %857 = vmatprep.subr.bf16.mxu0 %v1136_v10  ;;  %885 = vmatprep.subr.bf16.mxu1 %v1096_v3  ;;  %v1052_v36 = vld [vmem:[%s1343_s0 + $0x78] ss:$12 sps:$4 sm:$0xff]   ;;  %v1053_v38 = vld [vmem:[%s1343_s0 + $0x90] ss:$12 sps:$4 sm:$0xff]   ;;  %v1060_v41 = vld [vmem:[%s1343_s0 + $0xa8] ss:$12 sps:$4 sm:$0xff]  }
   0xe   :  { %376 = vmatprep.mubr.bf16.mxu1 %v1038_v18  ;;  %v1056_v37 = vld [vmem:[%s1343_s0 + $0x98] ss:$12 sps:$4 sm:$0xff]   ;;  %v1057_v39 = vld [vmem:[%s1343_s0 + $0xb0] ss:$12 sps:$4 sm:$0xff]  }
   0xf   :  { %v1058_v40 = vld [vmem:[%s1343_s0 + $0xac] ss:$12 sps:$4 sm:$0xff]  }
  0x10   :  { %858 = vmatpush3.bf16.msra.mxu0 %v1144_v11  ;;  %886 = vmatpush3.bf16.msra.mxu1 %v1109_v5 }
  0x11   :  { %859 = vmatprep.subr.bf16.mxu0 %v1151_v12  ;;  %887 = vmatprep.subr.bf16.mxu1 %v1115_v6 }
  0x14   :  { %860 = vmatpush3.bf16.msra.mxu0 %v1158_v13  ;;  %888 = vmatpush3.bf16.msra.mxu1 %v1125_v8 }
  0x15   :  { %861 = vmatprep.subr.bf16.mxu0 %v1165_v14  ;;  %889 = vmatprep.subr.bf16.mxu1 %v1136_v10 }
  0x18   :  { %862 = vmatpush3.bf16.msra.mxu0 %v1170_v15  ;;  %890 = vmatpush3.bf16.msra.mxu1 %v1144_v11 }
  0x19   :  { %863 = vmatprep.subr.bf16.mxu0 %v1177_v16  ;;  %891 = vmatprep.subr.bf16.mxu1 %v1151_v12 }
  0x1c   :  { %864 = vmatpush3.bf16.msra.mxu0 %v1192_v19  ;;  %892 = vmatpush3.bf16.msra.mxu1 %v1158_v13 }
  0x1d   :  { %865 = vmatprep.subr.bf16.mxu0 %v1199_v20  ;;  %893 = vmatprep.subr.bf16.mxu1 %v1165_v14 }
  0x20   :  { %866 = vmatpush3.bf16.msra.mxu0 %v1206_v21  ;;  %894 = vmatpush3.bf16.msra.mxu1 %v1170_v15 }
  0x21   :  { %895 = vmatprep.subr.bf16.mxu1 %v1177_v16  ;;  %987 = vmatprep.subr.bf16.mxu0 %v1084_v1 }
  0x23   :  { %234 = vmatmul.mubr.bf16.vlgmr.msra.gmra.mrb[0].mxu0 %v1031_v22 }
  0x24   :  { %896 = vmatpush3.bf16.msra.mxu1 %v1192_v19  ;;  %988 = vmatpush3.bf16.msra.mxu0 %v1084_v1 }
  0x25   :  { %897 = vmatprep.subr.bf16.mxu1 %v1199_v20  ;;  %241 = vmatprep.mubr.bf16.mxu0 %v1034_v23 }
  0x26   :  { %989 = vmatprep.subr.bf16.mxu0 %v1103_v4 }
  0x28   :  { %898 = vmatpush3.bf16.msra.mxu1 %v1206_v21  ;;  %990 = vmatpush3.bf16.msra.mxu0 %v1103_v4 }
  0x29   :  { %915 = vmatprep.subr.bf16.mxu1 %v1079_v0  ;;  %995 = vmatprep.subr.bf16.mxu0 %v1084_v1 }
  0x2b   :  { %242 = vmatmul.mubr.bf16.gmra.mrb[4].mxu0 %v1039_v25  ;;  %377 = vmatmul.mubr.bf16.vlgmr.msra.gmra.mrb[4].mxu1 %v1036_v24 }
  0x2c   :  { %916 = vmatpush3.bf16.msra.mxu1 %v1090_v2  ;;  %384 = vmatprep.mubr.bf16.mxu1 %v1040_v26 }
  0x2d   :  { %917 = vmatprep.subr.bf16.mxu1 %v1096_v3  ;;  %991 = vmatprep.mubr.msk.bf16.mxu0 %vm194_vm0, %v1042_v27 }
  0x30   :  { %918 = vmatpush3.bf16.msra.mxu1 %v1109_v5 }
  0x31   :  { %919 = vmatprep.subr.bf16.mxu1 %v1115_v6 }
  0x33   :  { %385 = vmatmul.mubr.bf16.gmra.mrb[8].mxu1 %v1043_v28  ;;  %992 = vmatmul.mubr.msk.bf16.vlgmr.msra.gmra.mrb[8].mxu0 %vm194_vm0, %v1044_v29 }
  0x34   :  { %996 = vmatpush3.bf16.msra.mxu0 %v1084_v1  ;;  %920 = vmatpush3.bf16.msra.mxu1 %v1125_v8 }
  0x35   :  { %997 = vmatprep.subr.bf16.mxu0 %v1103_v4  ;;  %921 = vmatprep.subr.bf16.mxu1 %v1136_v10 }
  0x36   :  { %999 = vmatprep.mubr.msk.bf16.mxu0 %vm194_vm0, %v1045_v30  ;;  %523 = vmatprep.mubr.bf16.mxu1 %v1049_v31 }
  0x38   :  { %998 = vmatpush3.bf16.msra.mxu0 %v1103_v4  ;;  %922 = vmatpush3.bf16.msra.mxu1 %v1144_v11 }
  0x39   :  { %947 = vmatprep.subr.bf16.mxu0 %v1079_v0  ;;  %923 = vmatprep.subr.bf16.mxu1 %v1151_v12 }
  0x3b   :  { %1000 = vmatmul.mubr.msk.bf16.vlgmr.msra.gmra.mrb[12].mxu0 %vm194_vm0, %v1046_v32 }
  0x3c   :  { %948 = vmatpush3.bf16.msra.mxu0 %v1090_v2  ;;  %924 = vmatpush3.bf16.msra.mxu1 %v1158_v13 }
  0x3d   :  { %949 = vmatprep.subr.bf16.mxu0 %v1096_v3  ;;  %925 = vmatprep.subr.bf16.mxu1 %v1165_v14 }
  0x3e   :  { %670 = vmatprep.mubr.bf16.mxu0 %v1055_v33 }
  0x40   :  { %950 = vmatpush3.bf16.msra.mxu0 %v1109_v5  ;;  %926 = vmatpush3.bf16.msra.mxu1 %v1170_v15 }
  0x41   :  { %951 = vmatprep.subr.bf16.mxu0 %v1115_v6  ;;  %927 = vmatprep.subr.bf16.mxu1 %v1177_v16 }
  0x44   :  { %952 = vmatpush3.bf16.msra.mxu0 %v1125_v8  ;;  %928 = vmatpush3.bf16.msra.mxu1 %v1192_v19 }
  0x45   :  { %953 = vmatprep.subr.bf16.mxu0 %v1136_v10  ;;  %929 = vmatprep.subr.bf16.mxu1 %v1199_v20 }
  0x48   :  { %954 = vmatpush3.bf16.msra.mxu0 %v1144_v11  ;;  %930 = vmatpush3.bf16.msra.mxu1 %v1206_v21 }
  0x49   :  { %955 = vmatprep.subr.bf16.mxu0 %v1151_v12  ;;  %1003 = vmatprep.subr.bf16.mxu1 %v1084_v1 }
  0x4b   :  { %524 = vmatmul.mubr.bf16.vlgmr.msra.gmra.mrb[12].mxu1 %v1047_v34 }
  0x4c   :  { %956 = vmatpush3.bf16.msra.mxu0 %v1158_v13  ;;  %531 = vmatprep.mubr.bf16.mxu1 %v1050_v35 }
  0x4d   :  { %957 = vmatprep.subr.bf16.mxu0 %v1165_v14  ;;  %1004 = vmatpush3.bf16.msra.mxu1 %v1084_v1 }
  0x4e   :  { %1005 = vmatprep.subr.bf16.mxu1 %v1103_v4 }
  0x50   :  { %958 = vmatpush3.bf16.msra.mxu0 %v1170_v15 }
  0x51   :  { %959 = vmatprep.subr.bf16.mxu0 %v1177_v16  ;;  %1006 = vmatpush3.bf16.msra.mxu1 %v1103_v4 }
  0x53   :  { %532 = vmatmul.mubr.bf16.gmra.mrb[16].mxu1 %v1052_v36 }
  0x54   :  { %960 = vmatpush3.bf16.msra.mxu0 %v1192_v19  ;;  %1007 = vmatprep.mubr.msk.bf16.mxu1 %vm194_vm0, %v1056_v37 }
  0x55   :  { %961 = vmatprep.subr.bf16.mxu0 %v1199_v20 }
  0x58   :  { %962 = vmatpush3.bf16.msra.mxu0 %v1206_v21 }
  0x5b   :  { %671 = vmatmul.mubr.bf16.vlgmr.msra.gmra.mrb[16].mxu0 %v1053_v38  ;;  %1008 = vmatmul.mubr.msk.bf16.vlgmr.msra.gmra.mrb[20].mxu1 %vm194_vm0, %v1057_v39 }
  0x5c   :  { %678 = vmatprep.mubr.bf16.mxu0 %v1058_v40 }
  0x63   :  { %679 = vmatmul.mubr.bf16.gmra.mrb[20].mxu0 %v1060_v41 }
  0xde   :  { %v985_v42 = vpop.f32.mrb[0].mxu1 }
  0xdf   :  { %v284_v43 = vpop.f32.mrb[1].mxu1 }
  0xe0   :  { %v986_v44 = vpop.f32.mrb[2].mxu1 }
  0xe1   :  { %v287_v45 = vpop.f32.mrb[3].mxu1 }
  0xf6   :  { %v867_v46 = vpop.f32.mrb[0].mxu0 }
  0xf7   :  { %v868_v47 = vpop.f32.mrb[1].mxu0 }
  0xf8   :  { %v869_v48 = vadd.f32 %v868_v47, %v867_v46  ;;  %v870_v49 = vpop.f32.mrb[2].mxu0 }
  0xf9   :  { %v871_v50 = vpop.f32.mrb[3].mxu0 }
  0xfa   :  { %v285_v51 = vadd.f32 %v869_v48, %v284_v43  ;;  %v872_v52 = vadd.f32 %v871_v50, %v870_v49 }
  0xfc   :  { %v288_v53 = vadd.f32 %v872_v52, %v287_v45 }
  0xfe   :  { %v873_v54 = vpop.f32.mrb[4].mxu0  ;;  %v899_v55 = vpop.f32.mrb[4].mxu1 }
  0xff   :  { %v874_v56 = vpop.f32.mrb[5].mxu0  ;;  %v900_v57 = vpop.f32.mrb[5].mxu1 }
 0x100   :  { %v875_v58 = vadd.f32 %v874_v56, %v873_v54  ;;  %v876_v59 = vpop.f32.mrb[6].mxu0  ;;  %v901_v60 = vadd.f32 %v900_v57, %v899_v55  ;;  %v902_v61 = vpop.f32.mrb[6].mxu1 }
 0x101   :  { %v877_v62 = vpop.f32.mrb[7].mxu0  ;;  %v903_v63 = vpop.f32.mrb[7].mxu1 }
 0x102   :  { %v293_v0 = vadd.f32 %v985_v42, %v875_v58  ;;  %v878_v1 = vadd.f32 %v877_v62, %v876_v59  ;;  %v904_v2 = vadd.f32 %v903_v63, %v902_v61 }
 0x104   :  { %v296_v3 = vadd.f32 %v986_v44, %v878_v1 }
 0x106   :  { %v905_v4 = vpop.f32.mrb[8].mxu1  ;;  %v993_v5 = vpop.f32.mrb[8].mxu0 }
 0x107   :  { %v906_v6 = vpop.f32.mrb[9].mxu1  ;;  %v427_v7 = vpop.f32.mrb[9].mxu0 }
 0x108   :  { %v907_v8 = vadd.f32 %v906_v6, %v905_v4  ;;  %v428_v9 = vadd.f32 %v901_v60, %v427_v7  ;;  %v908_v10 = vpop.f32.mrb[10].mxu1  ;;  %v994_v11 = vpop.f32.mrb[10].mxu0 }
 0x109   :  { %v909_v12 = vpop.f32.mrb[11].mxu1  ;;  %v430_v13 = vpop.f32.mrb[11].mxu0 }
 0x10a   :  { %v436_v14 = vadd.f32 %v993_v5, %v907_v8  ;;  %v442_v15 = vmax.f32 %v285_v51, %v428_v9  ;;  %v910_v16 = vadd.f32 %v909_v12, %v908_v10  ;;  %v431_v17 = vadd.f32 %v904_v2, %v430_v13 }
 0x10c   :  { %v444_v18 = vmax.f32 %v293_v0, %v436_v14  ;;  %v439_v19 = vadd.f32 %v994_v11, %v910_v16  ;;  %v443_v20 = vmax.f32 %v288_v53, %v431_v17 }
 0x10e   :  { %v445_v21 = vmax.f32 %v296_v3, %v439_v19  ;;  %v1001_v22 = vpop.f32.mrb[12].mxu0 }
 0x10f   :  { %v574_v23 = vpop.f32.mrb[13].mxu0 }
 0x110   :  { %v1002_v24 = vpop.f32.mrb[14].mxu0 }
 0x111   :  { %v577_v25 = vpop.f32.mrb[15].mxu0 }
 0x11e   :  { %v931_v26 = vpop.f32.mrb[12].mxu1 }
 0x11f   :  { %v932_v27 = vpop.f32.mrb[13].mxu1 }
 0x120   :  { %v933_v28 = vadd.f32 %v932_v27, %v931_v26  ;;  %v934_v29 = vpop.f32.mrb[14].mxu1 }
 0x121   :  { %v935_v30 = vpop.f32.mrb[15].mxu1 }
 0x122   :  { %v575_v31 = vadd.f32 %v933_v28, %v574_v23  ;;  %v936_v32 = vadd.f32 %v935_v30, %v934_v29 }
 0x124   :  { %v578_v33 = vadd.f32 %v936_v32, %v577_v25  ;;  %v589_v34 = vmax.f32 %v442_v15, %v575_v31 }
 0x126   :  { %v937_v35 = vpop.f32.mrb[16].mxu1  ;;  %v590_v36 = vmax.f32 %v443_v20, %v578_v33 }
 0x127   :  { %v938_v37 = vpop.f32.mrb[17].mxu1 }
 0x128   :  { %v939_v38 = vadd.f32 %v938_v37, %v937_v35  ;;  %v940_v39 = vpop.f32.mrb[18].mxu1 }
 0x129   :  { %v941_v40 = vpop.f32.mrb[19].mxu1 }
 0x12a   :  { %v583_v41 = vadd.f32 %v1001_v22, %v939_v38  ;;  %v942_v42 = vadd.f32 %v941_v40, %v940_v39 }
 0x12c   :  { %v591_v43 = vmax.f32 %v444_v18, %v583_v41  ;;  %v586_v44 = vadd.f32 %v1002_v24, %v942_v42 }
 0x12e   :  { %v592_v45 = vmax.f32 %v445_v21, %v586_v44  ;;  %v963_v46 = vpop.f32.mrb[16].mxu0  ;;  %v1009_v47 = vpop.f32.mrb[20].mxu1 }
 0x12f   :  { %v964_v48 = vpop.f32.mrb[17].mxu0  ;;  %v721_v49 = vpop.f32.mrb[21].mxu1 }
 0x130   :  { %v965_v50 = vadd.f32 %v964_v48, %v963_v46  ;;  %v966_v51 = vpop.f32.mrb[18].mxu0  ;;  %v1010_v52 = vpop.f32.mrb[22].mxu1 }
 0x131   :  { %v967_v53 = vpop.f32.mrb[19].mxu0  ;;  %v724_v54 = vpop.f32.mrb[23].mxu1 }
 0x132   :  { %v968_v55 = vadd.f32 %v967_v53, %v966_v51  ;;  %v722_v56 = vadd.f32 %v965_v50, %v721_v49 }
 0x134   :  { %v736_v57 = vmax.f32 %v589_v34, %v722_v56  ;;  %v725_v58 = vadd.f32 %v968_v55, %v724_v54 }
 0x136   :  { %v740_v59 = vmax.f32 %v736_v57, 0.0  ;;  %v737_v60 = vmax.f32 %v590_v36, %v725_v58  ;;  %v969_v61 = vpop.f32.mrb[20].mxu0 }
 0x137   :  { %v970_v62 = vpop.f32.mrb[21].mxu0 }
 0x138   :  { %v847_v63 = vpack.c.bf16 %v740_v59, %v740_v59  ;;  %v741_v0 = vmax.f32 %v737_v60, 0.0  ;;  %v971_v1 = vadd.f32 %v970_v62, %v969_v61  ;;  %v972_v2 = vpop.f32.mrb[22].mxu0 }
 0x139   :  { %v973_v3 = vpop.f32.mrb[23].mxu0 }
 0x13a   :  { %761 = vst.msk [vmem:[%s1344_s2] sm:$0xf] %vm760_vm1, %v847_v63  ;;  %v848_v4 = vpack.c.bf16 %v741_v0, %v741_v0  ;;  %v730_v5 = vadd.f32 %v1009_v47, %v971_v1  ;;  %v974_v6 = vadd.f32 %v973_v3, %v972_v2 }
 0x13c   :  { %762 = vst.msk [vmem:[%s1344_s2 + $0x4] sm:$0xf] %vm760_vm1, %v848_v4  ;;  %v738_v7 = vmax.f32 %v591_v43, %v730_v5  ;;  %v733_v8 = vadd.f32 %v1010_v52, %v974_v6 }
 0x13e   :  { %v742_v9 = vmax.f32 %v738_v7, 0.0  ;;  %v739_v10 = vmax.f32 %v592_v45, %v733_v8 }
 0x140   :  { %v849_v11 = vpack.c.bf16 %v742_v9, %v742_v9  ;;  %v743_v12 = vmax.f32 %v739_v10, 0.0 }
 0x142   :  { %763 = vst.msk [vmem:[%s1344_s2 + $0x8] sm:$0xf] %vm760_vm1, %v849_v11  ;;  %v850_v13 = vpack.c.bf16 %v743_v12, %v743_v12 }
 0x144   :  { %764 = vst.msk [vmem:[%s1344_s2 + $0xc] sm:$0xf] %vm760_vm1, %v850_v13 }

// kernel: base_svhnet_forward.6
= control target key start
LH: loop header
LB: loop body
LE: loop exit
PB: predicated region body
PF: predicated region fallthrough
CT: control target
= control target key end

     0   :  { %vm194_vm0 = vcmask 261120   ;;  %vm319_vm1 = vcmask 257024   ;;  %s531_s1 = inlined_call_operand.vmem [shape: bf16[288,32], index: 1, kind: input, shape index: {}]   ;;  %s532_s0 = inlined_call_operand.vmem [shape: bf16[1,32,288], index: 0, kind: input, shape index: {}]   ;;  %s533_s2 = inlined_call_operand.vmem [shape: bf16[32,32], index: 2, kind: output, shape index: {}]  }
   0x1   :  { %v402_v0 = vld [vmem:[%s531_s1 + $0x40] sm:$0xff]   ;;  %v404_v2 = vld [vmem:[%s531_s1 + $0x48] sm:$0xff]   ;;  %v406_v4 = vld [vmem:[%s531_s1 + $0x50] sm:$0xff]  }
   0x2   :  { %v403_v1 = vld [vmem:[%s531_s1] sm:$0xff]   ;;  %362 = vmatprep.subr.bf16.mxu0 %v402_v0  ;;  %v405_v3 = vld [vmem:[%s531_s1 + $0x8] sm:$0xff]   ;;  %v407_v5 = vld [vmem:[%s531_s1 + $0x10] sm:$0xff]  }
   0x3   :  { %363 = vmatpush3.bf16.msra.mxu0 %v403_v1  ;;  %v408_v6 = vld [vmem:[%s531_s1 + $0x58] sm:$0xff]   ;;  %v410_v8 = vld [vmem:[%s531_s1 + $0x60] sm:$0xff]   ;;  %v412_v11 = vld [vmem:[%s531_s1 + $0x68] sm:$0xff]  }
   0x4   :  { %364 = vmatprep.subr.bf16.mxu0 %v404_v2  ;;  %v409_v7 = vld [vmem:[%s531_s1 + $0x18] sm:$0xff]   ;;  %v416_v9 = vld [vmem:[%s531_s1 + $0x80] sm:$0xff]   ;;  %v413_v12 = vld [vmem:[%s531_s1 + $0x28] sm:$0xff]  }
   0x5   :  { %v411_v10 = vld [vmem:[%s531_s1 + $0x20] sm:$0xff]   ;;  %394 = vmatprep.subr.bf16.mxu1 %v416_v9  ;;  %v419_v13 = vld [vmem:[%s531_s1 + $0x88] sm:$0xff]   ;;  %v414_v14 = vld [vmem:[%s531_s1 + $0x70] sm:$0xff]  }
   0x6   :  { %395 = vmatpush3.bf16.msra.mxu1 %v416_v9  ;;  %v422_v15 = vld [vmem:[%s532_s0 + $0x4] ss:$12 sps:$4 sm:$0xff]   ;;  %v423_v16 = vld [vmem:[%s532_s0 + $0x8] ss:$12 sps:$4 sm:$0xff]   ;;  %v424_v17 = vld [vmem:[%s532_s0 + $0x20] ss:$12 sps:$4 sm:$0xff]  }
   0x7   :  { %365 = vmatpush3.bf16.msra.mxu0 %v405_v3  ;;  %396 = vmatprep.subr.bf16.mxu1 %v419_v13  ;;  %v415_v18 = vld [vmem:[%s531_s1 + $0x30] sm:$0xff]   ;;  %v417_v19 = vld [vmem:[%s531_s1 + $0x78] sm:$0xff]   ;;  %v420_v21 = vld [vmem:[%s532_s0] ss:$12 sps:$4 sm:$0xff]  }
   0x8   :  { %366 = vmatprep.subr.bf16.mxu0 %v406_v4  ;;  %233 = vmatprep.mubr.bf16.mxu0 %v422_v15  ;;  %v418_v20 = vld [vmem:[%s531_s1 + $0x38] sm:$0xff]  }
   0x9   :  { %398 = vmatprep.mubr.msk.bf16.mxu1 %vm194_vm0, %v423_v16  ;;  %v425_v22 = vld [vmem:[%s532_s0 + $0x1c] ss:$12 sps:$4 sm:$0xff]   ;;  %v427_v23 = vld [vmem:[%s532_s0 + $0x18] ss:$12 sps:$4 sm:$0xff]  }
   0xa   :  { %397 = vmatpush3.bf16.msra.mxu1 %v419_v13 }
   0xb   :  { %367 = vmatpush3.bf16.msra.mxu0 %v407_v5 }
   0xc   :  { %368 = vmatprep.subr.bf16.mxu0 %v408_v6 }
   0xd   :  { %399 = vmatmul.mubr.msk.bf16.vlgmr.msra.gmra.mrb[0].mxu1 %vm194_vm0, %v424_v17 }
   0xf   :  { %369 = vmatpush3.bf16.msra.mxu0 %v409_v7 }
  0x10   :  { %370 = vmatprep.subr.bf16.mxu0 %v410_v8 }
  0x13   :  { %371 = vmatpush3.bf16.msra.mxu0 %v411_v10 }
  0x14   :  { %372 = vmatprep.subr.bf16.mxu0 %v412_v11 }
  0x17   :  { %373 = vmatpush3.bf16.msra.mxu0 %v413_v12 }
  0x18   :  { %374 = vmatprep.subr.bf16.mxu0 %v414_v14 }
  0x1b   :  { %375 = vmatpush3.bf16.msra.mxu0 %v415_v18 }
  0x1c   :  { %376 = vmatprep.subr.bf16.mxu0 %v417_v19 }
  0x1f   :  { %377 = vmatpush3.bf16.msra.mxu0 %v418_v20 }
  0x22   :  { %234 = vmatmul.mubr.bf16.vlgmr.msra.gmra.mrb[0].mxu0 %v420_v21 }
  0x23   :  { %241 = vmatprep.mubr.bf16.mxu0 %v425_v22 }
  0x2a   :  { %242 = vmatmul.mubr.bf16.gmra.mrb[4].mxu0 %v427_v23 }
  0xe0   :  { %v400_v24 = vpop.f32.mrb[0].mxu1 }
  0xe1   :  { %v284_v25 = vpop.f32.mrb[1].mxu1 }
  0xe2   :  { %v401_v26 = vpop.f32.mrb[2].mxu1 }
  0xe3   :  { %v287_v27 = vpop.f32.mrb[3].mxu1 }
  0xf5   :  { %v378_v28 = vpop.f32.mrb[0].mxu0 }
  0xf6   :  { %v379_v29 = vpop.f32.mrb[1].mxu0 }
  0xf7   :  { %v380_v30 = vadd.f32 %v379_v29, %v378_v28  ;;  %v381_v31 = vpop.f32.mrb[2].mxu0 }
  0xf8   :  { %v382_v32 = vpop.f32.mrb[3].mxu0 }
  0xf9   :  { %v383_v33 = vadd.f32 %v382_v32, %v381_v31  ;;  %v285_v34 = vadd.f32 %v380_v30, %v284_v25 }
  0xfb   :  { %v299_v35 = vmax.f32 %v285_v34, 0.0  ;;  %v288_v36 = vadd.f32 %v383_v33, %v287_v27 }
  0xfd   :  { %v358_v37 = vpack.c.bf16 %v299_v35, %v299_v35  ;;  %v300_v38 = vmax.f32 %v288_v36, 0.0  ;;  %v384_v39 = vpop.f32.mrb[4].mxu0 }
  0xfe   :  { %v385_v40 = vpop.f32.mrb[5].mxu0 }
  0xff   :  { %320 = vst.msk [vmem:[%s533_s2] sm:$0xf] %vm319_vm1, %v358_v37  ;;  %v359_v41 = vpack.c.bf16 %v300_v38, %v300_v38  ;;  %v386_v42 = vadd.f32 %v385_v40, %v384_v39  ;;  %v387_v43 = vpop.f32.mrb[6].mxu0 }
 0x100   :  { %v388_v44 = vpop.f32.mrb[7].mxu0 }
 0x101   :  { %321 = vst.msk [vmem:[%s533_s2 + $0x4] sm:$0xf] %vm319_vm1, %v359_v41  ;;  %v293_v45 = vadd.f32 %v400_v24, %v386_v42  ;;  %v389_v46 = vadd.f32 %v388_v44, %v387_v43 }
 0x103   :  { %v301_v47 = vmax.f32 %v293_v45, 0.0  ;;  %v296_v48 = vadd.f32 %v401_v26, %v389_v46 }
 0x105   :  { %v360_v49 = vpack.c.bf16 %v301_v47, %v301_v47  ;;  %v302_v50 = vmax.f32 %v296_v48, 0.0 }
 0x107   :  { %322 = vst.msk [vmem:[%s533_s2 + $0x8] sm:$0xf] %vm319_vm1, %v360_v49  ;;  %v361_v51 = vpack.c.bf16 %v302_v50, %v302_v50 }
 0x109   :  { %323 = vst.msk [vmem:[%s533_s2 + $0xc] sm:$0xf] %vm319_vm1, %v361_v51 }

// kernel: base_svhnet_forward.7
= control target key start
LH: loop header
LB: loop body
LE: loop exit
PB: predicated region body
PF: predicated region fallthrough
CT: control target
= control target key end

     0   :  { %v281_v35 = vlaneseq  ;;  %v3184_v36 = vmov 1966171168   ;;  %s4255_s0 = inlined_call_operand.vmem [shape: bf16[2,512], index: 0, kind: input, shape index: {}]   ;;  %s4256_s1 = inlined_call_operand.vmem [shape: bf16[512,1024], index: 1, kind: input, shape index: {}]   ;;  %s4257_s2 = inlined_call_operand.vmem [shape: f32[1,1024], index: 2, kind: input, shape index: {}]   ;;  %s4258_s3 = inlined_call_operand.vmem [shape: bf16[1024,128], index: 3, kind: input, shape index: {}]   ;;  %s4259_s4 = inlined_call_operand.vmem [shape: f32[1,128], index: 4, kind: input, shape index: {}]   ;;  %s4260_s5 = inlined_call_operand.hbm [shape: f32[2,128], index: 5, kind: output, shape index: {}]  }
   0x1   :  { %v23_v0 = vld [vmem:[%s4256_s1] sm:$0xff]  ;;  %v24_v2 = vld [vmem:[%s4256_s1 + $0x8] sm:$0xff]  ;;  %v331_v37 = vunpack.c.l.s4 %v3184_v36 }
   0x2   :  { %v27_v1 = vld [vmem:[%s4256_s1 + $0x20] sm:$0xff]  ;;  %v28_v4 = vld [vmem:[%s4256_s1 + $0x28] sm:$0xff]  ;;  %v3288_v46 = vshrl.u32 %v281_v35, 7 }
   0x3   :  { %v2662_v3 = vcombine.high %v23_v0, %v27_v1  ;;  %v2661_v5 = vcombine.low %v23_v0, %v27_v1  ;;  %v31_v6 = vld [vmem:[%s4256_s1 + $0x40] sm:$0xff]  ;;  %v2664_v8 = vcombine.high %v24_v2, %v28_v4  ;;  %v2663_v9 = vcombine.low %v24_v2, %v28_v4  ;;  %v32_v11 = vld [vmem:[%s4256_s1 + $0x48] sm:$0xff] }
   0x4   :  { %v35_v7 = vld [vmem:[%s4256_s1 + $0x60] sm:$0xff]  ;;  %v36_v12 = vld [vmem:[%s4256_s1 + $0x68] sm:$0xff]  ;;  %v332_v47 = vunpack.c.0.s8 %v331_v37 }
   0x5   :  { %v2670_v10 = vcombine.high %v31_v6, %v35_v7  ;;  %v39_v13 = vld [vmem:[%s4256_s1 + $0x80] sm:$0xff]  ;;  %1630 = vmatprep.subr.bf16.mxu0 %v2662_v3  ;;  %v2672_v14 = vcombine.high %v32_v11, %v36_v12  ;;  %v40_v16 = vld [vmem:[%s4256_s1 + $0x88] sm:$0xff]  ;;  %1712 = vmatprep.subr.bf16.mxu1 %v2664_v8  ;;  %v2669_v18 = vcombine.low %v31_v6, %v35_v7 }
   0x6   :  { %v43_v15 = vld [vmem:[%s4256_s1 + $0xa0] sm:$0xff]  ;;  %v44_v17 = vld [vmem:[%s4256_s1 + $0xa8] sm:$0xff]  ;;  %1631 = vmatpush1.bf16.msra.mxu0 %v2661_v5  ;;  %1713 = vmatpush1.bf16.msra.mxu1 %v2663_v9  ;;  %v2671_v19 = vcombine.low %v32_v11, %v36_v12  ;;  %v3303_v56 = vsub.s32 %v332_v47, %v3288_v46 }
   0x7   :  { %1632 = vmatprep.subr.bf16.mxu0 %v2670_v10  ;;  %v2678_v20 = vcombine.high %v39_v13, %v43_v15  ;;  %1714 = vmatprep.subr.bf16.mxu1 %v2672_v14  ;;  %v2680_v21 = vcombine.high %v40_v16, %v44_v17  ;;  %v47_v22 = vld [vmem:[%s4256_s1 + $0xc0] sm:$0xff]  ;;  %v48_v24 = vld [vmem:[%s4256_s1 + $0xc8] sm:$0xff]  ;;  %v2677_v26 = vcombine.low %v39_v13, %v43_v15 }
   0x8   :  { %v51_v23 = vld [vmem:[%s4256_s1 + $0xe0] sm:$0xff]  ;;  %v52_v25 = vld [vmem:[%s4256_s1 + $0xe8] sm:$0xff]  ;;  %v2679_v27 = vcombine.low %v40_v16, %v44_v17 }
   0x9   :  { %v2686_v28 = vcombine.high %v47_v22, %v51_v23  ;;  %v2688_v29 = vcombine.high %v48_v24, %v52_v25  ;;  %v55_v30 = vld [vmem:[%s4256_s1 + $0x100] sm:$0xff]  ;;  %v56_v32 = vld [vmem:[%s4256_s1 + $0x108] sm:$0xff]  ;;  %v2685_v34 = vcombine.low %v47_v22, %v51_v23  ;;  %v2687_v38 = vcombine.low %v48_v24, %v52_v25 }
   0xa   :  { %1633 = vmatpush1.bf16.msra.mxu0 %v2669_v18  ;;  %1715 = vmatpush1.bf16.msra.mxu1 %v2671_v19  ;;  %v59_v31 = vld [vmem:[%s4256_s1 + $0x120] sm:$0xff]  ;;  %v60_v33 = vld [vmem:[%s4256_s1 + $0x128] sm:$0xff] }
   0xb   :  { %1634 = vmatprep.subr.bf16.mxu0 %v2678_v20  ;;  %1716 = vmatprep.subr.bf16.mxu1 %v2680_v21  ;;  %v2694_v39 = vcombine.high %v55_v30, %v59_v31  ;;  %v2696_v40 = vcombine.high %v56_v32, %v60_v33  ;;  %v63_v41 = vld [vmem:[%s4256_s1 + $0x140] sm:$0xff]  ;;  %v64_v43 = vld [vmem:[%s4256_s1 + $0x148] sm:$0xff]  ;;  %v2693_v45 = vcombine.low %v55_v30, %v59_v31 }
   0xc   :  { %v67_v42 = vld [vmem:[%s4256_s1 + $0x160] sm:$0xff]  ;;  %v68_v44 = vld [vmem:[%s4256_s1 + $0x168] sm:$0xff]  ;;  %v2695_v48 = vcombine.low %v56_v32, %v60_v33 }
   0xd   :  { %v2702_v49 = vcombine.high %v63_v41, %v67_v42  ;;  %v2704_v50 = vcombine.high %v64_v43, %v68_v44  ;;  %v71_v51 = vld [vmem:[%s4256_s1 + $0x180] sm:$0xff]  ;;  %v72_v53 = vld [vmem:[%s4256_s1 + $0x188] sm:$0xff]  ;;  %v2701_v55 = vcombine.low %v63_v41, %v67_v42  ;;  %v2703_v57 = vcombine.low %v64_v43, %v68_v44 }
   0xe   :  { %1635 = vmatpush1.bf16.msra.mxu0 %v2677_v26  ;;  %1717 = vmatpush1.bf16.msra.mxu1 %v2679_v27  ;;  %v75_v52 = vld [vmem:[%s4256_s1 + $0x1a0] sm:$0xff]  ;;  %v76_v54 = vld [vmem:[%s4256_s1 + $0x1a8] sm:$0xff] }
   0xf   :  { %1636 = vmatprep.subr.bf16.mxu0 %v2686_v28  ;;  %1718 = vmatprep.subr.bf16.mxu1 %v2688_v29  ;;  %v2710_v58 = vcombine.high %v71_v51, %v75_v52  ;;  %v3308_v59 = vld.sshfl [vmem:[%s4255_s0] sm:$0x33 pattern:$0x75316420]  ;;  %v2712_v60 = vcombine.high %v72_v53, %v76_v54  ;;  %v80_v0 = vld [vmem:[%s4256_s1 + $0x1c8] sm:$0xff]  ;;  %v2709_v2 = vcombine.low %v71_v51, %v75_v52 }
  0x10   :  { %v79_v61 = vld [vmem:[%s4256_s1 + $0x1c0] sm:$0xff]  ;;  %v329_v63 = vcombine.high %v3308_v59, %v3308_v59  ;;  %v84_v1 = vld [vmem:[%s4256_s1 + $0x1e8] sm:$0xff]  ;;  %v2711_v4 = vcombine.low %v72_v53, %v76_v54 }
  0x11   :  { %v83_v62 = vld [vmem:[%s4256_s1 + $0x1e0] sm:$0xff]  ;;  %v2720_v6 = vcombine.high %v80_v0, %v84_v1  ;;  %v88_v9 = vld [vmem:[%s4256_s1 + $0x208] sm:$0xff]  ;;  %v2719_v12 = vcombine.low %v80_v0, %v84_v1 }
  0x12   :  { %1637 = vmatpush1.bf16.msra.mxu0 %v2685_v34  ;;  %1719 = vmatpush1.bf16.msra.mxu1 %v2687_v38  ;;  %v3325_v3 = vrot.slane %v329_v63, %v3303_v56  ;;  %v2718_v5 = vcombine.high %v79_v61, %v83_v62  ;;  %v87_v7 = vld [vmem:[%s4256_s1 + $0x200] sm:$0xff]  ;;  %v92_v10 = vld [vmem:[%s4256_s1 + $0x228] sm:$0xff]  ;;  %v2717_v11 = vcombine.low %v79_v61, %v83_v62 }
  0x13   :  { %1638 = vmatprep.subr.bf16.mxu0 %v2694_v39  ;;  %1720 = vmatprep.subr.bf16.mxu1 %v2696_v40  ;;  %v91_v8 = vld [vmem:[%s4256_s1 + $0x220] sm:$0xff]  ;;  %v2728_v14 = vcombine.high %v88_v9, %v92_v10  ;;  %v96_v17 = vld [vmem:[%s4256_s1 + $0x248] sm:$0xff]  ;;  %v2727_v20 = vcombine.low %v88_v9, %v92_v10 }
  0x14   :  { %1662 = vmatprep.mubr.bf16.mxu0 %v3325_v3  ;;  %1744 = vmatprep.mubr.bf16.mxu1 %v3325_v3  ;;  %v2726_v13 = vcombine.high %v87_v7, %v91_v8  ;;  %v95_v15 = vld [vmem:[%s4256_s1 + $0x240] sm:$0xff]  ;;  %v100_v18 = vld [vmem:[%s4256_s1 + $0x268] sm:$0xff]  ;;  %v2725_v19 = vcombine.low %v87_v7, %v91_v8 }
  0x15   :  { %v99_v16 = vld [vmem:[%s4256_s1 + $0x260] sm:$0xff]  ;;  %v2736_v22 = vcombine.high %v96_v17, %v100_v18  ;;  %v104_v25 = vld [vmem:[%s4256_s1 + $0x288] sm:$0xff]  ;;  %v2735_v28 = vcombine.low %v96_v17, %v100_v18 }
  0x16   :  { %1639 = vmatpush1.bf16.msra.mxu0 %v2693_v45  ;;  %1721 = vmatpush1.bf16.msra.mxu1 %v2695_v48  ;;  %v2734_v21 = vcombine.high %v95_v15, %v99_v16  ;;  %v103_v23 = vld [vmem:[%s4256_s1 + $0x280] sm:$0xff]  ;;  %v108_v26 = vld [vmem:[%s4256_s1 + $0x2a8] sm:$0xff]  ;;  %v2733_v27 = vcombine.low %v95_v15, %v99_v16 }
  0x17   :  { %1640 = vmatprep.subr.bf16.mxu0 %v2702_v49  ;;  %1722 = vmatprep.subr.bf16.mxu1 %v2704_v50  ;;  %v107_v24 = vld [vmem:[%s4256_s1 + $0x2a0] sm:$0xff]  ;;  %v2744_v30 = vcombine.high %v104_v25, %v108_v26  ;;  %v112_v33 = vld [vmem:[%s4256_s1 + $0x2c8] sm:$0xff]  ;;  %v2743_v36 = vcombine.low %v104_v25, %v108_v26 }
  0x18   :  { %v2742_v29 = vcombine.high %v103_v23, %v107_v24  ;;  %v111_v31 = vld [vmem:[%s4256_s1 + $0x2c0] sm:$0xff]  ;;  %v116_v34 = vld [vmem:[%s4256_s1 + $0x2e8] sm:$0xff]  ;;  %v2741_v35 = vcombine.low %v103_v23, %v107_v24 }
  0x19   :  { %v115_v32 = vld [vmem:[%s4256_s1 + $0x2e0] sm:$0xff]  ;;  %v2752_v38 = vcombine.high %v112_v33, %v116_v34  ;;  %v120_v41 = vld [vmem:[%s4256_s1 + $0x308] sm:$0xff]  ;;  %v2751_v44 = vcombine.low %v112_v33, %v116_v34 }
  0x1a   :  { %1641 = vmatpush1.bf16.msra.mxu0 %v2701_v55  ;;  %1723 = vmatpush1.bf16.msra.mxu1 %v2703_v57  ;;  %v2750_v37 = vcombine.high %v111_v31, %v115_v32  ;;  %v119_v39 = vld [vmem:[%s4256_s1 + $0x300] sm:$0xff]  ;;  %v124_v42 = vld [vmem:[%s4256_s1 + $0x328] sm:$0xff]  ;;  %v2749_v43 = vcombine.low %v111_v31, %v115_v32 }
  0x1b   :  { %1642 = vmatprep.subr.bf16.mxu0 %v2710_v58  ;;  %1724 = vmatprep.subr.bf16.mxu1 %v2712_v60  ;;  %v123_v40 = vld [vmem:[%s4256_s1 + $0x320] sm:$0xff]  ;;  %v2760_v47 = vcombine.high %v120_v41, %v124_v42  ;;  %v128_v50 = vld [vmem:[%s4256_s1 + $0x348] sm:$0xff]  ;;  %v2759_v53 = vcombine.low %v120_v41, %v124_v42 }
  0x1c   :  { %v2758_v45 = vcombine.high %v119_v39, %v123_v40  ;;  %v127_v48 = vld [vmem:[%s4256_s1 + $0x340] sm:$0xff]  ;;  %v132_v51 = vld [vmem:[%s4256_s1 + $0x368] sm:$0xff]  ;;  %v2757_v52 = vcombine.low %v119_v39, %v123_v40 }
  0x1d   :  { %v131_v49 = vld [vmem:[%s4256_s1 + $0x360] sm:$0xff]  ;;  %v2768_v55 = vcombine.high %v128_v50, %v132_v51  ;;  %v136_v60 = vld [vmem:[%s4256_s1 + $0x388] sm:$0xff]  ;;  %v2767_v63 = vcombine.low %v128_v50, %v132_v51 }
  0x1e   :  { %1643 = vmatpush1.bf16.msra.mxu0 %v2709_v2  ;;  %1725 = vmatpush1.bf16.msra.mxu1 %v2711_v4  ;;  %v2766_v54 = vcombine.high %v127_v48, %v131_v49  ;;  %v135_v57 = vld [vmem:[%s4256_s1 + $0x380] sm:$0xff]  ;;  %v140_v61 = vld [vmem:[%s4256_s1 + $0x3a8] sm:$0xff]  ;;  %v2765_v62 = vcombine.low %v127_v48, %v131_v49 }
  0x1f   :  { %1644 = vmatprep.subr.bf16.mxu0 %v2718_v5  ;;  %1726 = vmatprep.subr.bf16.mxu1 %v2720_v6  ;;  %v139_v58 = vld [vmem:[%s4256_s1 + $0x3a0] sm:$0xff]  ;;  %v2776_v1 = vcombine.high %v136_v60, %v140_v61  ;;  %v144_v5 = vld [vmem:[%s4256_s1 + $0x3c8] sm:$0xff]  ;;  %v2775_v8 = vcombine.low %v136_v60, %v140_v61 }
  0x20   :  { %v2774_v0 = vcombine.high %v135_v57, %v139_v58  ;;  %v143_v2 = vld [vmem:[%s4256_s1 + $0x3c0] sm:$0xff]  ;;  %v148_v6 = vld [vmem:[%s4256_s1 + $0x3e8] sm:$0xff]  ;;  %v2773_v7 = vcombine.low %v135_v57, %v139_v58 }
  0x21   :  { %v147_v4 = vld [vmem:[%s4256_s1 + $0x3e0] sm:$0xff]  ;;  %v2784_v10 = vcombine.high %v144_v5, %v148_v6  ;;  %v2783_v16 = vcombine.low %v144_v5, %v148_v6  ;;  %v164_v23 = vld [vmem:[%s4256_s1 + $0x468] sm:$0xff] }
  0x22   :  { %1645 = vmatpush1.bf16.msra.mxu0 %v2717_v11  ;;  %1727 = vmatpush1.bf16.msra.mxu1 %v2719_v12  ;;  %v2782_v9 = vcombine.high %v143_v2, %v147_v4  ;;  %v151_v11 = vld [vmem:[%s4256_s1 + $0x400] sm:$0xff]  ;;  %v2781_v15 = vcombine.low %v143_v2, %v147_v4 }
  0x23   :  { %1646 = vmatprep.subr.bf16.mxu0 %v2726_v13  ;;  %1728 = vmatprep.subr.bf16.mxu1 %v2728_v14  ;;  %v155_v12 = vld [vmem:[%s4256_s1 + $0x420] sm:$0xff]  ;;  %v152_v13 = vld [vmem:[%s4256_s1 + $0x408] sm:$0xff] }
  0x24   :  { %v156_v14 = vld [vmem:[%s4256_s1 + $0x428] sm:$0xff]  ;;  %v2790_v17 = vcombine.high %v151_v11, %v155_v12  ;;  %v2789_v24 = vcombine.low %v151_v11, %v155_v12  ;;  %v175_v34 = vld [vmem:[%s4256_s1 + $0x4c0] sm:$0xff] }
  0x25   :  { %v2792_v18 = vcombine.high %v152_v13, %v156_v14  ;;  %v2791_v25 = vcombine.low %v152_v13, %v156_v14  ;;  %v183_v42 = vld [vmem:[%s4256_s1 + $0x500] sm:$0xff] }
  0x26   :  { %1647 = vmatpush1.bf16.msra.mxu0 %v2725_v19  ;;  %1729 = vmatpush1.bf16.msra.mxu1 %v2727_v20  ;;  %v159_v19 = vld [vmem:[%s4256_s1 + $0x440] sm:$0xff] }
  0x27   :  { %1648 = vmatprep.subr.bf16.mxu0 %v2734_v21  ;;  %1730 = vmatprep.subr.bf16.mxu1 %v2736_v22  ;;  %v163_v20 = vld [vmem:[%s4256_s1 + $0x460] sm:$0xff]  ;;  %v3445_v21 = vrot.slane %v3308_v59, %v3303_v56  ;;  %v160_v22 = vld [vmem:[%s4256_s1 + $0x448] sm:$0xff] }
  0x28   :  { %v2798_v26 = vcombine.high %v159_v19, %v163_v20  ;;  %v171_v56 = vld [vmem:[%s4256_s1 + $0x4a0] sm:$0xff]  ;;  %v168_v59 = vld [vmem:[%s4256_s1 + $0x488] sm:$0xff]  ;;  %v2797_v31 = vcombine.low %v159_v19, %v163_v20  ;;  %v2799_v32 = vcombine.low %v160_v22, %v164_v23 }
  0x29   :  { %v191_v51 = vld [vmem:[%s4256_s1 + $0x540] sm:$0xff] }
  0x2a   :  { %1649 = vmatpush1.bf16.msra.mxu0 %v2733_v27  ;;  %1731 = vmatpush1.bf16.msra.mxu1 %v2735_v28  ;;  %v167_v27 = vld [vmem:[%s4256_s1 + $0x480] sm:$0xff]  ;;  %v2800_v28 = vcombine.high %v160_v22, %v164_v23 }
  0x2b   :  { %1650 = vmatprep.subr.bf16.mxu0 %v2742_v29  ;;  %1732 = vmatprep.subr.bf16.mxu1 %v2744_v30  ;;  %v172_v29 = vld [vmem:[%s4256_s1 + $0x4a8] sm:$0xff]  ;;  %v3467_v30 = vcombine.high %v3325_v3, %v3325_v3  ;;  %v2806_v33 = vcombine.high %v167_v27, %v171_v56  ;;  %v2805_v39 = vcombine.low %v167_v27, %v171_v56  ;;  %v199_v61 = vld [vmem:[%s4256_s1 + $0x580] sm:$0xff] }
  0x2c   :  { %v2807_v40 = vcombine.low %v168_v59, %v172_v29  ;;  %v207_v6 = vld [vmem:[%s4256_s1 + $0x5c0] sm:$0xff]  ;;  %v228_v27 = vld [vmem:[%s4256_s1 + $0x668] sm:$0xff] }
  0x2d   :  { %v215_v14 = vld [vmem:[%s4256_s1 + $0x600] sm:$0xff] }
  0x2e   :  { %1651 = vmatpush1.bf16.msra.mxu0 %v2741_v35  ;;  %1733 = vmatpush1.bf16.msra.mxu1 %v2743_v36  ;;  %v179_v35 = vld [vmem:[%s4256_s1 + $0x4e0] sm:$0xff]  ;;  %v176_v36 = vld [vmem:[%s4256_s1 + $0x4c8] sm:$0xff] }
  0x2f   :  { %1652 = vmatprep.subr.bf16.mxu0 %v2750_v37  ;;  %1734 = vmatprep.subr.bf16.mxu1 %v2752_v38  ;;  %v2808_v37 = vcombine.high %v168_v59, %v172_v29  ;;  %v180_v38 = vld [vmem:[%s4256_s1 + $0x4e8] sm:$0xff]  ;;  %v2814_v41 = vcombine.high %v175_v34, %v179_v35  ;;  %v2813_v48 = vcombine.low %v175_v34, %v179_v35  ;;  %v223_v23 = vld [vmem:[%s4256_s1 + $0x640] sm:$0xff] }
  0x30   :  { %v2815_v49 = vcombine.low %v176_v36, %v180_v38  ;;  %v231_v29 = vld [vmem:[%s4256_s1 + $0x680] sm:$0xff]  ;;  %v236_v34 = vld [vmem:[%s4256_s1 + $0x6a8] sm:$0xff] }
  0x32   :  { %1653 = vmatpush1.bf16.msra.mxu0 %v2749_v43  ;;  %1735 = vmatpush1.bf16.msra.mxu1 %v2751_v44  ;;  %v187_v43 = vld [vmem:[%s4256_s1 + $0x520] sm:$0xff]  ;;  %v184_v44 = vld [vmem:[%s4256_s1 + $0x508] sm:$0xff] }
  0x33   :  { %1654 = vmatprep.subr.bf16.mxu0 %v2758_v45  ;;  %1736 = vmatprep.subr.bf16.mxu1 %v2760_v47  ;;  %v2816_v45 = vcombine.high %v176_v36, %v180_v38  ;;  %v188_v47 = vld [vmem:[%s4256_s1 + $0x528] sm:$0xff]  ;;  %v2822_v50 = vcombine.high %v183_v42, %v187_v43  ;;  %v2821_v57 = vcombine.low %v183_v42, %v187_v43  ;;  %v239_v38 = vld [vmem:[%s4256_s1 + $0x6c0] sm:$0xff] }
  0x34   :  { %v2823_v58 = vcombine.low %v184_v44, %v188_v47  ;;  %v244_v42 = vld [vmem:[%s4256_s1 + $0x6e8] sm:$0xff] }
  0x36   :  { %1655 = vmatpush1.bf16.msra.mxu0 %v2757_v52  ;;  %1737 = vmatpush1.bf16.msra.mxu1 %v2759_v53  ;;  %v195_v52 = vld [vmem:[%s4256_s1 + $0x560] sm:$0xff]  ;;  %v192_v53 = vld [vmem:[%s4256_s1 + $0x548] sm:$0xff] }
  0x37   :  { %1656 = vmatprep.subr.bf16.mxu0 %v2766_v54  ;;  %1738 = vmatprep.subr.bf16.mxu1 %v2768_v55  ;;  %v2824_v54 = vcombine.high %v184_v44, %v188_v47  ;;  %v196_v55 = vld [vmem:[%s4256_s1 + $0x568] sm:$0xff]  ;;  %v2830_v60 = vcombine.high %v191_v51, %v195_v52  ;;  %v2829_v2 = vcombine.low %v191_v51, %v195_v52  ;;  %v247_v47 = vld [vmem:[%s4256_s1 + $0x700] sm:$0xff] }
  0x38   :  { %v2831_v4 = vcombine.low %v192_v53, %v196_v55  ;;  %v252_v51 = vld [vmem:[%s4256_s1 + $0x728] sm:$0xff] }
  0x3a   :  { %1657 = vmatpush1.bf16.msra.mxu0 %v2765_v62  ;;  %1739 = vmatpush1.bf16.msra.mxu1 %v2767_v63  ;;  %v203_v62 = vld [vmem:[%s4256_s1 + $0x5a0] sm:$0xff]  ;;  %v200_v63 = vld [vmem:[%s4256_s1 + $0x588] sm:$0xff] }
  0x3b   :  { %1658 = vmatprep.subr.bf16.mxu0 %v2774_v0  ;;  %1740 = vmatprep.subr.bf16.mxu1 %v2776_v1  ;;  %v2832_v0 = vcombine.high %v192_v53, %v196_v55  ;;  %v204_v1 = vld [vmem:[%s4256_s1 + $0x5a8] sm:$0xff]  ;;  %v2838_v5 = vcombine.high %v199_v61, %v203_v62  ;;  %v2837_v11 = vcombine.low %v199_v61, %v203_v62  ;;  %v255_v55 = vld [vmem:[%s4256_s1 + $0x740] sm:$0xff] }
  0x3c   :  { %v2839_v12 = vcombine.low %v200_v63, %v204_v1  ;;  %v260_v61 = vld [vmem:[%s4256_s1 + $0x768] sm:$0xff] }
  0x3e   :  { %1659 = vmatpush1.bf16.msra.mxu0 %v2773_v7  ;;  %1741 = vmatpush1.bf16.msra.mxu1 %v2775_v8  ;;  %v211_v7 = vld [vmem:[%s4256_s1 + $0x5e0] sm:$0xff]  ;;  %v208_v8 = vld [vmem:[%s4256_s1 + $0x5c8] sm:$0xff] }
  0x3f   :  { %1660 = vmatprep.subr.bf16.mxu0 %v2782_v9  ;;  %1742 = vmatprep.subr.bf16.mxu1 %v2784_v10  ;;  %v2840_v9 = vcombine.high %v200_v63, %v204_v1  ;;  %v212_v10 = vld [vmem:[%s4256_s1 + $0x5e8] sm:$0xff]  ;;  %v2846_v13 = vcombine.high %v207_v6, %v211_v7  ;;  %v2845_v19 = vcombine.low %v207_v6, %v211_v7  ;;  %v263_v1 = vld [vmem:[%s4256_s1 + $0x780] sm:$0xff] }
  0x40   :  { %v2847_v20 = vcombine.low %v208_v8, %v212_v10  ;;  %v268_v6 = vld [vmem:[%s4256_s1 + $0x7a8] sm:$0xff] }
  0x42   :  { %1661 = vmatpush1.bf16.msra.mxu0 %v2781_v15  ;;  %1743 = vmatpush1.bf16.msra.mxu1 %v2783_v16  ;;  %v219_v15 = vld [vmem:[%s4256_s1 + $0x620] sm:$0xff]  ;;  %v216_v16 = vld [vmem:[%s4256_s1 + $0x608] sm:$0xff] }
  0x43   :  { %1671 = vmatprep.subr.bf16.mxu0 %v2790_v17  ;;  %1753 = vmatprep.subr.bf16.mxu1 %v2792_v18  ;;  %v2848_v17 = vcombine.high %v208_v8, %v212_v10  ;;  %v220_v18 = vld [vmem:[%s4256_s1 + $0x628] sm:$0xff]  ;;  %v2854_v22 = vcombine.high %v215_v14, %v219_v15  ;;  %v2853_v56 = vcombine.low %v215_v14, %v219_v15  ;;  %v271_v10 = vld [vmem:[%s4256_s1 + $0x7c0] sm:$0xff] }
  0x44   :  { %v2855_v59 = vcombine.low %v216_v16, %v220_v18  ;;  %v276_v14 = vld [vmem:[%s4256_s1 + $0x7e8] sm:$0xff] }
  0x45   :  { %1663 = vmatmul.mubr.bf16.vlgmr.msra.gmra.mrb[0].mxu0 %v3445_v21  ;;  %1745 = vmatmul.mubr.bf16.vlgmr.msra.gmra.mrb[0].mxu1 %v3445_v21 }
  0x46   :  { %1672 = vmatpush1.bf16.msra.mxu0 %v2789_v24  ;;  %1754 = vmatpush1.bf16.msra.mxu1 %v2791_v25  ;;  %v227_v24 = vld [vmem:[%s4256_s1 + $0x660] sm:$0xff]  ;;  %v224_v25 = vld [vmem:[%s4256_s1 + $0x648] sm:$0xff] }
  0x47   :  { %1673 = vmatprep.subr.bf16.mxu0 %v2798_v26  ;;  %1755 = vmatprep.subr.bf16.mxu1 %v2800_v28  ;;  %v2856_v26 = vcombine.high %v216_v16, %v220_v18  ;;  %v2862_v28 = vcombine.high %v223_v23, %v227_v24  ;;  %v2861_v35 = vcombine.low %v223_v23, %v227_v24  ;;  %v25_v18 = vld [vmem:[%s4256_s1 + $0x10] sm:$0xff]  ;;  %v30_v23 = vld [vmem:[%s4256_s1 + $0x38] sm:$0xff] }
  0x48   :  { %1703 = vmatprep.mubr.bf16.mxu0 %v3467_v30  ;;  %1785 = vmatprep.mubr.bf16.mxu1 %v3467_v30  ;;  %v2863_v36 = vcombine.low %v224_v25, %v228_v27 }
  0x4a   :  { %1674 = vmatpush1.bf16.msra.mxu0 %v2797_v31  ;;  %1756 = vmatpush1.bf16.msra.mxu1 %v2799_v32  ;;  %v235_v31 = vld [vmem:[%s4256_s1 + $0x6a0] sm:$0xff]  ;;  %v232_v32 = vld [vmem:[%s4256_s1 + $0x688] sm:$0xff] }
  0x4b   :  { %1675 = vmatprep.subr.bf16.mxu0 %v2806_v33  ;;  %1757 = vmatprep.subr.bf16.mxu1 %v2808_v37  ;;  %v2864_v33 = vcombine.high %v224_v25, %v228_v27  ;;  %v2870_v37 = vcombine.high %v231_v29, %v235_v31  ;;  %v2869_v43 = vcombine.low %v231_v29, %v235_v31  ;;  %v33_v27 = vld [vmem:[%s4256_s1 + $0x50] sm:$0xff]  ;;  %v38_v29 = vld [vmem:[%s4256_s1 + $0x78] sm:$0xff] }
  0x4c   :  { %v2871_v44 = vcombine.low %v232_v32, %v236_v34  ;;  %v3655_v31 = vcombine.high %v3445_v21, %v3445_v21 }
  0x4e   :  { %1676 = vmatpush1.bf16.msra.mxu0 %v2805_v39  ;;  %1758 = vmatpush1.bf16.msra.mxu1 %v2807_v40  ;;  %v243_v39 = vld [vmem:[%s4256_s1 + $0x6e0] sm:$0xff]  ;;  %v240_v40 = vld [vmem:[%s4256_s1 + $0x6c8] sm:$0xff] }
  0x4f   :  { %1677 = vmatprep.subr.bf16.mxu0 %v2814_v41  ;;  %1759 = vmatprep.subr.bf16.mxu1 %v2816_v45  ;;  %v2872_v41 = vcombine.high %v232_v32, %v236_v34  ;;  %v2878_v45 = vcombine.high %v239_v38, %v243_v39  ;;  %v2877_v52 = vcombine.low %v239_v38, %v243_v39 }
  0x50   :  { %v2879_v53 = vcombine.low %v240_v40, %v244_v42 }
  0x52   :  { %1678 = vmatpush1.bf16.msra.mxu0 %v2813_v48  ;;  %1760 = vmatpush1.bf16.msra.mxu1 %v2815_v49  ;;  %v251_v48 = vld [vmem:[%s4256_s1 + $0x720] sm:$0xff]  ;;  %v248_v49 = vld [vmem:[%s4256_s1 + $0x708] sm:$0xff] }
  0x53   :  { %1679 = vmatprep.subr.bf16.mxu0 %v2822_v50  ;;  %1761 = vmatprep.subr.bf16.mxu1 %v2824_v54  ;;  %v2880_v50 = vcombine.high %v240_v40, %v244_v42  ;;  %v2886_v54 = vcombine.high %v247_v47, %v251_v48  ;;  %v2885_v62 = vcombine.low %v247_v47, %v251_v48 }
  0x54   :  { %v2887_v63 = vcombine.low %v248_v49, %v252_v51 }
  0x56   :  { %1680 = vmatpush1.bf16.msra.mxu0 %v2821_v57  ;;  %1762 = vmatpush1.bf16.msra.mxu1 %v2823_v58  ;;  %v259_v57 = vld [vmem:[%s4256_s1 + $0x760] sm:$0xff]  ;;  %v256_v58 = vld [vmem:[%s4256_s1 + $0x748] sm:$0xff] }
  0x57   :  { %1681 = vmatprep.subr.bf16.mxu0 %v2830_v60  ;;  %1763 = vmatprep.subr.bf16.mxu1 %v2832_v0  ;;  %v2888_v60 = vcombine.high %v248_v49, %v252_v51  ;;  %v2894_v0 = vcombine.high %v255_v55, %v259_v57  ;;  %v2893_v7 = vcombine.low %v255_v55, %v259_v57 }
  0x58   :  { %v2895_v8 = vcombine.low %v256_v58, %v260_v61 }
  0x5a   :  { %1682 = vmatpush1.bf16.msra.mxu0 %v2829_v2  ;;  %1764 = vmatpush1.bf16.msra.mxu1 %v2831_v4  ;;  %v267_v2 = vld [vmem:[%s4256_s1 + $0x7a0] sm:$0xff]  ;;  %v264_v4 = vld [vmem:[%s4256_s1 + $0x788] sm:$0xff] }
  0x5b   :  { %1683 = vmatprep.subr.bf16.mxu0 %v2838_v5  ;;  %1765 = vmatprep.subr.bf16.mxu1 %v2840_v9  ;;  %v2896_v5 = vcombine.high %v256_v58, %v260_v61  ;;  %v2902_v9 = vcombine.high %v263_v1, %v267_v2  ;;  %v2901_v15 = vcombine.low %v263_v1, %v267_v2 }
  0x5c   :  { %v2903_v16 = vcombine.low %v264_v4, %v268_v6 }
  0x5e   :  { %1684 = vmatpush1.bf16.msra.mxu0 %v2837_v11  ;;  %1766 = vmatpush1.bf16.msra.mxu1 %v2839_v12  ;;  %v275_v11 = vld [vmem:[%s4256_s1 + $0x7e0] sm:$0xff]  ;;  %v272_v12 = vld [vmem:[%s4256_s1 + $0x7c8] sm:$0xff] }
  0x5f   :  { %1685 = vmatprep.subr.bf16.mxu0 %v2846_v13  ;;  %1767 = vmatprep.subr.bf16.mxu1 %v2848_v17  ;;  %v2904_v13 = vcombine.high %v264_v4, %v268_v6  ;;  %v2910_v17 = vcombine.high %v271_v10, %v275_v11  ;;  %v2909_v24 = vcombine.low %v271_v10, %v275_v11 }
  0x60   :  { %v2911_v25 = vcombine.low %v272_v12, %v276_v14 }
  0x62   :  { %1686 = vmatpush1.bf16.msra.mxu0 %v2845_v19  ;;  %1768 = vmatpush1.bf16.msra.mxu1 %v2847_v20  ;;  %v29_v19 = vld [vmem:[%s4256_s1 + $0x30] sm:$0xff]  ;;  %v26_v20 = vld [vmem:[%s4256_s1 + $0x18] sm:$0xff] }
  0x63   :  { %1687 = vmatprep.subr.bf16.mxu0 %v2854_v22  ;;  %1769 = vmatprep.subr.bf16.mxu1 %v2856_v26  ;;  %v2912_v22 = vcombine.high %v272_v12, %v276_v14  ;;  %v2666_v26 = vcombine.high %v25_v18, %v29_v19  ;;  %v2665_v32 = vcombine.low %v25_v18, %v29_v19 }
  0x66   :  { %1688 = vmatpush1.bf16.msra.mxu0 %v2853_v56  ;;  %1770 = vmatpush1.bf16.msra.mxu1 %v2855_v59  ;;  %v37_v56 = vld [vmem:[%s4256_s1 + $0x70] sm:$0xff]  ;;  %v34_v59 = vld [vmem:[%s4256_s1 + $0x58] sm:$0xff] }
  0x67   :  { %1689 = vmatprep.subr.bf16.mxu0 %v2862_v28  ;;  %1771 = vmatprep.subr.bf16.mxu1 %v2864_v33  ;;  %v2668_v28 = vcombine.high %v26_v20, %v30_v23 }
  0x6a   :  { %1690 = vmatpush1.bf16.msra.mxu0 %v2861_v35  ;;  %1772 = vmatpush1.bf16.msra.mxu1 %v2863_v36 }
  0x6b   :  { %1691 = vmatprep.subr.bf16.mxu0 %v2870_v37  ;;  %1773 = vmatprep.subr.bf16.mxu1 %v2872_v41 }
  0x6e   :  { %1692 = vmatpush1.bf16.msra.mxu0 %v2869_v43  ;;  %1774 = vmatpush1.bf16.msra.mxu1 %v2871_v44 }
  0x6f   :  { %1693 = vmatprep.subr.bf16.mxu0 %v2878_v45  ;;  %1775 = vmatprep.subr.bf16.mxu1 %v2880_v50 }
  0x72   :  { %1694 = vmatpush1.bf16.msra.mxu0 %v2877_v52  ;;  %1776 = vmatpush1.bf16.msra.mxu1 %v2879_v53 }
  0x73   :  { %1695 = vmatprep.subr.bf16.mxu0 %v2886_v54  ;;  %1777 = vmatprep.subr.bf16.mxu1 %v2888_v60 }
  0x76   :  { %1696 = vmatpush1.bf16.msra.mxu0 %v2885_v62  ;;  %1778 = vmatpush1.bf16.msra.mxu1 %v2887_v63 }
  0x77   :  { %1697 = vmatprep.subr.bf16.mxu0 %v2894_v0  ;;  %1779 = vmatprep.subr.bf16.mxu1 %v2896_v5 }
  0x7a   :  { %1698 = vmatpush1.bf16.msra.mxu0 %v2893_v7  ;;  %1780 = vmatpush1.bf16.msra.mxu1 %v2895_v8 }
  0x7b   :  { %1699 = vmatprep.subr.bf16.mxu0 %v2902_v9  ;;  %1781 = vmatprep.subr.bf16.mxu1 %v2904_v13 }
  0x7e   :  { %1700 = vmatpush1.bf16.msra.mxu0 %v2901_v15  ;;  %1782 = vmatpush1.bf16.msra.mxu1 %v2903_v16 }
  0x7f   :  { %1701 = vmatprep.subr.bf16.mxu0 %v2910_v17  ;;  %1783 = vmatprep.subr.bf16.mxu1 %v2912_v22 }
  0x82   :  { %1702 = vmatpush1.bf16.msra.mxu0 %v2909_v24 }
  0x83   :  { %10 = vsyncpa [#allocation3], 0  ;;  %1784 = vmatpush1.bf16.msra.mxu1 %v2911_v25  ;;  %1794 = vmatprep.subr.bf16.mxu0 %v2666_v26  ;;  %v2667_v33 = vcombine.low %v26_v20, %v30_v23  ;;  %v2674_v34 = vcombine.high %v33_v27, %v37_v56  ;;  %v2676_v35 = vcombine.high %v34_v59, %v38_v29  ;;  %v41_v36 = vld [vmem:[%s4256_s1 + $0x90] sm:$0xff]  ;;  %v42_v38 = vld [vmem:[%s4256_s1 + $0x98] sm:$0xff] }
  0x84   :  { %1876 = vmatprep.subr.bf16.mxu1 %v2668_v28  ;;  %v45_v37 = vld [vmem:[%s4256_s1 + $0xb0] sm:$0xff]  ;;  %v46_v39 = vld [vmem:[%s4256_s1 + $0xb8] sm:$0xff]  ;;  %v2673_v40 = vcombine.low %v33_v27, %v37_v56  ;;  %v2675_v41 = vcombine.low %v34_v59, %v38_v29 }
  0x85   :  { %1704 = vmatmul.mubr.bf16.vlgmr.msra.gmra.mrb[0].mxu0 %v3655_v31  ;;  %v2682_v42 = vcombine.high %v41_v36, %v45_v37  ;;  %v2684_v43 = vcombine.high %v42_v38, %v46_v39  ;;  %v49_v44 = vld [vmem:[%s4256_s1 + $0xd0] sm:$0xff]  ;;  %v50_v47 = vld [vmem:[%s4256_s1 + $0xd8] sm:$0xff]  ;;  %v2681_v49 = vcombine.low %v41_v36, %v45_v37  ;;  %v2683_v50 = vcombine.low %v42_v38, %v46_v39 }
  0x86   :  { %1786 = vmatmul.mubr.bf16.vlgmr.msra.gmra.mrb[0].mxu1 %v3655_v31  ;;  %1795 = vmatpush1.bf16.msra.mxu0 %v2665_v32  ;;  %v53_v45 = vld [vmem:[%s4256_s1 + $0xf0] sm:$0xff]  ;;  %v54_v48 = vld [vmem:[%s4256_s1 + $0xf8] sm:$0xff] }
  0x87   :  { %1877 = vmatpush1.bf16.msra.mxu1 %v2667_v33  ;;  %1796 = vmatprep.subr.bf16.mxu0 %v2674_v34  ;;  %v2690_v51 = vcombine.high %v49_v44, %v53_v45  ;;  %v2692_v52 = vcombine.high %v50_v47, %v54_v48  ;;  %v57_v53 = vld [vmem:[%s4256_s1 + $0x110] sm:$0xff]  ;;  %v62_v55 = vld [vmem:[%s4256_s1 + $0x138] sm:$0xff]  ;;  %v2689_v57 = vcombine.low %v49_v44, %v53_v45 }
  0x88   :  { %1878 = vmatprep.subr.bf16.mxu1 %v2676_v35  ;;  %1826 = vmatprep.mubr.bf16.mxu0 %v3325_v3  ;;  %v61_v54 = vld [vmem:[%s4256_s1 + $0x130] sm:$0xff]  ;;  %v2691_v58 = vcombine.low %v50_v47, %v54_v48  ;;  %v66_v0 = vld [vmem:[%s4256_s1 + $0x158] sm:$0xff] }
  0x89   :  { %1908 = vmatprep.mubr.bf16.mxu1 %v3325_v3  ;;  %v58_v3 = vld [vmem:[%s4256_s1 + $0x118] sm:$0xff]  ;;  %v2698_v60 = vcombine.high %v57_v53, %v61_v54  ;;  %v65_v62 = vld [vmem:[%s4256_s1 + $0x150] sm:$0xff]  ;;  %v2697_v2 = vcombine.low %v57_v53, %v61_v54 }
  0x8a   :  { %1797 = vmatpush1.bf16.msra.mxu0 %v2673_v40  ;;  %v2700_v61 = vcombine.high %v58_v3, %v62_v55  ;;  %v69_v63 = vld [vmem:[%s4256_s1 + $0x170] sm:$0xff]  ;;  %v70_v1 = vld [vmem:[%s4256_s1 + $0x178] sm:$0xff]  ;;  %v2699_v4 = vcombine.low %v58_v3, %v62_v55 }
  0x8b   :  { %1879 = vmatpush1.bf16.msra.mxu1 %v2675_v41  ;;  %1798 = vmatprep.subr.bf16.mxu0 %v2682_v42  ;;  %v2706_v5 = vcombine.high %v65_v62, %v69_v63  ;;  %v2708_v6 = vcombine.high %v66_v0, %v70_v1  ;;  %v73_v7 = vld [vmem:[%s4256_s1 + $0x190] sm:$0xff]  ;;  %v74_v9 = vld [vmem:[%s4256_s1 + $0x198] sm:$0xff]  ;;  %v2705_v11 = vcombine.low %v65_v62, %v69_v63 }
  0x8c   :  { %1880 = vmatprep.subr.bf16.mxu1 %v2684_v43  ;;  %v77_v8 = vld [vmem:[%s4256_s1 + $0x1b0] sm:$0xff]  ;;  %v78_v10 = vld [vmem:[%s4256_s1 + $0x1b8] sm:$0xff]  ;;  %v2707_v12 = vcombine.low %v66_v0, %v70_v1 }
  0x8d   :  { %v2714_v13 = vcombine.high %v73_v7, %v77_v8  ;;  %v2716_v14 = vcombine.high %v74_v9, %v78_v10  ;;  %v81_v15 = vld [vmem:[%s4256_s1 + $0x1d0] sm:$0xff]  ;;  %v82_v17 = vld [vmem:[%s4256_s1 + $0x1d8] sm:$0xff]  ;;  %v2713_v19 = vcombine.low %v73_v7, %v77_v8  ;;  %v2715_v20 = vcombine.low %v74_v9, %v78_v10 }
  0x8e   :  { %1799 = vmatpush1.bf16.msra.mxu0 %v2681_v49  ;;  %v85_v16 = vld [vmem:[%s4256_s1 + $0x1f0] sm:$0xff]  ;;  %v86_v18 = vld [vmem:[%s4256_s1 + $0x1f8] sm:$0xff] }
  0x8f   :  { %1881 = vmatpush1.bf16.msra.mxu1 %v2683_v50  ;;  %1800 = vmatprep.subr.bf16.mxu0 %v2690_v51  ;;  %v2722_v22 = vcombine.high %v81_v15, %v85_v16  ;;  %v2724_v23 = vcombine.high %v82_v17, %v86_v18  ;;  %v89_v24 = vld [vmem:[%s4256_s1 + $0x210] sm:$0xff]  ;;  %v90_v26 = vld [vmem:[%s4256_s1 + $0x218] sm:$0xff]  ;;  %v2721_v56 = vcombine.low %v81_v15, %v85_v16 }
  0x90   :  { %1882 = vmatprep.subr.bf16.mxu1 %v2692_v52  ;;  %v93_v25 = vld [vmem:[%s4256_s1 + $0x230] sm:$0xff]  ;;  %v94_v27 = vld [vmem:[%s4256_s1 + $0x238] sm:$0xff]  ;;  %v2723_v59 = vcombine.low %v82_v17, %v86_v18 }
  0x91   :  { %v2730_v28 = vcombine.high %v89_v24, %v93_v25  ;;  %v2732_v29 = vcombine.high %v90_v26, %v94_v27  ;;  %v97_v32 = vld [vmem:[%s4256_s1 + $0x250] sm:$0xff]  ;;  %v98_v34 = vld [vmem:[%s4256_s1 + $0x258] sm:$0xff]  ;;  %v2729_v36 = vcombine.low %v89_v24, %v93_v25  ;;  %v2731_v37 = vcombine.low %v90_v26, %v94_v27 }
  0x92   :  { %1801 = vmatpush1.bf16.msra.mxu0 %v2689_v57  ;;  %v101_v33 = vld [vmem:[%s4256_s1 + $0x270] sm:$0xff]  ;;  %v102_v35 = vld [vmem:[%s4256_s1 + $0x278] sm:$0xff] }
  0x93   :  { %1883 = vmatpush1.bf16.msra.mxu1 %v2691_v58  ;;  %1802 = vmatprep.subr.bf16.mxu0 %v2698_v60  ;;  %v2738_v38 = vcombine.high %v97_v32, %v101_v33  ;;  %v2740_v39 = vcombine.high %v98_v34, %v102_v35  ;;  %v105_v40 = vld [vmem:[%s4256_s1 + $0x290] sm:$0xff]  ;;  %v106_v42 = vld [vmem:[%s4256_s1 + $0x298] sm:$0xff]  ;;  %v2737_v44 = vcombine.low %v97_v32, %v101_v33 }
  0x94   :  { %1884 = vmatprep.subr.bf16.mxu1 %v2700_v61  ;;  %v109_v41 = vld [vmem:[%s4256_s1 + $0x2b0] sm:$0xff]  ;;  %v110_v43 = vld [vmem:[%s4256_s1 + $0x2b8] sm:$0xff]  ;;  %v2739_v45 = vcombine.low %v98_v34, %v102_v35 }
  0x95   :  { %v2746_v47 = vcombine.high %v105_v40, %v109_v41  ;;  %v2748_v48 = vcombine.high %v106_v42, %v110_v43  ;;  %v113_v49 = vld [vmem:[%s4256_s1 + $0x2d0] sm:$0xff]  ;;  %v114_v51 = vld [vmem:[%s4256_s1 + $0x2d8] sm:$0xff]  ;;  %v2745_v53 = vcombine.low %v105_v40, %v109_v41  ;;  %v2747_v54 = vcombine.low %v106_v42, %v110_v43 }
  0x96   :  { %1803 = vmatpush1.bf16.msra.mxu0 %v2697_v2  ;;  %v117_v50 = vld [vmem:[%s4256_s1 + $0x2f0] sm:$0xff]  ;;  %v118_v52 = vld [vmem:[%s4256_s1 + $0x2f8] sm:$0xff] }
  0x97   :  { %1885 = vmatpush1.bf16.msra.mxu1 %v2699_v4  ;;  %1804 = vmatprep.subr.bf16.mxu0 %v2706_v5  ;;  %v2754_v3 = vcombine.high %v113_v49, %v117_v50  ;;  %v2756_v55 = vcombine.high %v114_v51, %v118_v52  ;;  %v121_v57 = vld [vmem:[%s4256_s1 + $0x310] sm:$0xff]  ;;  %v122_v60 = vld [vmem:[%s4256_s1 + $0x318] sm:$0xff]  ;;  %v2753_v62 = vcombine.low %v113_v49, %v117_v50 }
  0x98   :  { %1886 = vmatprep.subr.bf16.mxu1 %v2708_v6  ;;  %v125_v58 = vld [vmem:[%s4256_s1 + $0x330] sm:$0xff]  ;;  %v126_v61 = vld [vmem:[%s4256_s1 + $0x338] sm:$0xff]  ;;  %v2755_v63 = vcombine.low %v114_v51, %v118_v52 }
  0x99   :  { %v2762_v0 = vcombine.high %v121_v57, %v125_v58  ;;  %v2764_v1 = vcombine.high %v122_v60, %v126_v61  ;;  %v129_v2 = vld [vmem:[%s4256_s1 + $0x350] sm:$0xff]  ;;  %v130_v5 = vld [vmem:[%s4256_s1 + $0x358] sm:$0xff]  ;;  %v2761_v7 = vcombine.low %v121_v57, %v125_v58  ;;  %v2763_v8 = vcombine.low %v122_v60, %v126_v61 }
  0x9a   :  { %1805 = vmatpush1.bf16.msra.mxu0 %v2705_v11  ;;  %v133_v4 = vld [vmem:[%s4256_s1 + $0x370] sm:$0xff]  ;;  %v134_v6 = vld [vmem:[%s4256_s1 + $0x378] sm:$0xff] }
  0x9b   :  { %1887 = vmatpush1.bf16.msra.mxu1 %v2707_v12  ;;  %1806 = vmatprep.subr.bf16.mxu0 %v2714_v13  ;;  %v2770_v9 = vcombine.high %v129_v2, %v133_v4  ;;  %v2772_v10 = vcombine.high %v130_v5, %v134_v6  ;;  %v137_v11 = vld [vmem:[%s4256_s1 + $0x390] sm:$0xff]  ;;  %v138_v13 = vld [vmem:[%s4256_s1 + $0x398] sm:$0xff]  ;;  %v2769_v15 = vcombine.low %v129_v2, %v133_v4 }
  0x9c   :  { %1888 = vmatprep.subr.bf16.mxu1 %v2716_v14  ;;  %v141_v12 = vld [vmem:[%s4256_s1 + $0x3b0] sm:$0xff]  ;;  %v142_v14 = vld [vmem:[%s4256_s1 + $0x3b8] sm:$0xff]  ;;  %v2771_v16 = vcombine.low %v130_v5, %v134_v6 }
  0x9d   :  { %v2778_v17 = vcombine.high %v137_v11, %v141_v12  ;;  %v2780_v18 = vcombine.high %v138_v13, %v142_v14  ;;  %v2777_v24 = vcombine.low %v137_v11, %v141_v12  ;;  %v2779_v25 = vcombine.low %v138_v13, %v142_v14  ;;  %v185_v61 = vld [vmem:[%s4256_s1 + $0x510] sm:$0xff] }
  0x9e   :  { %1807 = vmatpush1.bf16.msra.mxu0 %v2713_v19  ;;  %v145_v19 = vld [vmem:[%s4256_s1 + $0x3d0] sm:$0xff] }
  0x9f   :  { %1889 = vmatpush1.bf16.msra.mxu1 %v2715_v20  ;;  %1808 = vmatprep.subr.bf16.mxu0 %v2722_v22  ;;  %v149_v20 = vld [vmem:[%s4256_s1 + $0x3f0] sm:$0xff]  ;;  %v146_v22 = vld [vmem:[%s4256_s1 + $0x3d8] sm:$0xff] }
  0xa0   :  { %1890 = vmatprep.subr.bf16.mxu1 %v2724_v23  ;;  %v150_v23 = vld [vmem:[%s4256_s1 + $0x3f8] sm:$0xff]  ;;  %v2786_v26 = vcombine.high %v145_v19, %v149_v20  ;;  %v2785_v32 = vcombine.low %v145_v19, %v149_v20  ;;  %v193_v5 = vld [vmem:[%s4256_s1 + $0x550] sm:$0xff] }
  0xa1   :  { %v2788_v27 = vcombine.high %v146_v22, %v150_v23  ;;  %v2787_v33 = vcombine.low %v146_v22, %v150_v23  ;;  %v197_v6 = vld [vmem:[%s4256_s1 + $0x570] sm:$0xff] }
  0xa2   :  { %1809 = vmatpush1.bf16.msra.mxu0 %v2721_v56  ;;  %v153_v56 = vld [vmem:[%s4256_s1 + $0x410] sm:$0xff]  ;;  %v2834_v11 = vcombine.high %v193_v5, %v197_v6 }
  0xa3   :  { %1891 = vmatpush1.bf16.msra.mxu1 %v2723_v59  ;;  %1810 = vmatprep.subr.bf16.mxu0 %v2730_v28  ;;  %v157_v59 = vld [vmem:[%s4256_s1 + $0x430] sm:$0xff]  ;;  %v154_v28 = vld [vmem:[%s4256_s1 + $0x418] sm:$0xff] }
  0xa4   :  { %1892 = vmatprep.subr.bf16.mxu1 %v2732_v29  ;;  %v158_v29 = vld [vmem:[%s4256_s1 + $0x438] sm:$0xff]  ;;  %v2794_v34 = vcombine.high %v153_v56, %v157_v59  ;;  %v2793_v40 = vcombine.low %v153_v56, %v157_v59  ;;  %v201_v13 = vld [vmem:[%s4256_s1 + $0x590] sm:$0xff] }
  0xa5   :  { %v2796_v35 = vcombine.high %v154_v28, %v158_v29  ;;  %v2795_v41 = vcombine.low %v154_v28, %v158_v29  ;;  %v205_v14 = vld [vmem:[%s4256_s1 + $0x5b0] sm:$0xff] }
  0xa6   :  { %1811 = vmatpush1.bf16.msra.mxu0 %v2729_v36  ;;  %v161_v36 = vld [vmem:[%s4256_s1 + $0x450] sm:$0xff]  ;;  %v2842_v19 = vcombine.high %v201_v13, %v205_v14 }
  0xa7   :  { %1893 = vmatpush1.bf16.msra.mxu1 %v2731_v37  ;;  %1812 = vmatprep.subr.bf16.mxu0 %v2738_v38  ;;  %v165_v37 = vld [vmem:[%s4256_s1 + $0x470] sm:$0xff]  ;;  %v162_v38 = vld [vmem:[%s4256_s1 + $0x458] sm:$0xff] }
  0xa8   :  { %1894 = vmatprep.subr.bf16.mxu1 %v2740_v39  ;;  %v166_v39 = vld [vmem:[%s4256_s1 + $0x478] sm:$0xff]  ;;  %v2802_v42 = vcombine.high %v161_v36, %v165_v37  ;;  %v2801_v49 = vcombine.low %v161_v36, %v165_v37  ;;  %v209_v22 = vld [vmem:[%s4256_s1 + $0x5d0] sm:$0xff] }
  0xa9   :  { %v2804_v43 = vcombine.high %v162_v38, %v166_v39  ;;  %v2803_v50 = vcombine.low %v162_v38, %v166_v39  ;;  %v213_v23 = vld [vmem:[%s4256_s1 + $0x5f0] sm:$0xff] }
  0xaa   :  { %1813 = vmatpush1.bf16.msra.mxu0 %v2737_v44  ;;  %v169_v44 = vld [vmem:[%s4256_s1 + $0x490] sm:$0xff]  ;;  %v2850_v56 = vcombine.high %v209_v22, %v213_v23 }
  0xab   :  { %1895 = vmatpush1.bf16.msra.mxu1 %v2739_v45  ;;  %1814 = vmatprep.subr.bf16.mxu0 %v2746_v47  ;;  %v173_v45 = vld [vmem:[%s4256_s1 + $0x4b0] sm:$0xff]  ;;  %v170_v47 = vld [vmem:[%s4256_s1 + $0x498] sm:$0xff] }
  0xac   :  { %1896 = vmatprep.subr.bf16.mxu1 %v2748_v48  ;;  %v174_v48 = vld [vmem:[%s4256_s1 + $0x4b8] sm:$0xff]  ;;  %v2810_v51 = vcombine.high %v169_v44, %v173_v45  ;;  %v217_v28 = vld [vmem:[%s4256_s1 + $0x610] sm:$0xff] }
  0xad   :  { %v2812_v52 = vcombine.high %v170_v47, %v174_v48  ;;  %v2811_v57 = vcombine.low %v170_v47, %v174_v48  ;;  %v221_v29 = vld [vmem:[%s4256_s1 + $0x630] sm:$0xff] }
  0xae   :  { %1815 = vmatpush1.bf16.msra.mxu0 %v2745_v53  ;;  %v177_v53 = vld [vmem:[%s4256_s1 + $0x4d0] sm:$0xff]  ;;  %v2858_v36 = vcombine.high %v217_v28, %v221_v29 }
  0xaf   :  { %1897 = vmatpush1.bf16.msra.mxu1 %v2747_v54  ;;  %1816 = vmatprep.subr.bf16.mxu0 %v2754_v3  ;;  %v181_v54 = vld [vmem:[%s4256_s1 + $0x4f0] sm:$0xff]  ;;  %v182_v3 = vld [vmem:[%s4256_s1 + $0x4f8] sm:$0xff] }
  0xb0   :  { %1898 = vmatprep.subr.bf16.mxu1 %v2756_v55  ;;  %v2809_v55 = vcombine.low %v169_v44, %v173_v45  ;;  %v2818_v58 = vcombine.high %v177_v53, %v181_v54  ;;  %v225_v38 = vld [vmem:[%s4256_s1 + $0x650] sm:$0xff] }
  0xb1   :  { %v229_v39 = vld [vmem:[%s4256_s1 + $0x670] sm:$0xff] }
  0xb2   :  { %1817 = vmatpush1.bf16.msra.mxu0 %v2753_v62  ;;  %v189_v62 = vld [vmem:[%s4256_s1 + $0x530] sm:$0xff]  ;;  %v2866_v44 = vcombine.high %v225_v38, %v229_v39 }
  0xb3   :  { %1899 = vmatpush1.bf16.msra.mxu1 %v2755_v63  ;;  %1818 = vmatprep.subr.bf16.mxu0 %v2762_v0  ;;  %v190_v63 = vld [vmem:[%s4256_s1 + $0x538] sm:$0xff]  ;;  %v2817_v0 = vcombine.low %v177_v53, %v181_v54  ;;  %v2826_v2 = vcombine.high %v185_v61, %v189_v62  ;;  %v233_v47 = vld [vmem:[%s4256_s1 + $0x690] sm:$0xff] }
  0xb4   :  { %1900 = vmatprep.subr.bf16.mxu1 %v2764_v1  ;;  %v237_v48 = vld [vmem:[%s4256_s1 + $0x6b0] sm:$0xff] }
  0xb5   :  { %v2874_v53 = vcombine.high %v233_v47, %v237_v48 }
  0xb6   :  { %1819 = vmatpush1.bf16.msra.mxu0 %v2761_v7  ;;  %v194_v7 = vld [vmem:[%s4256_s1 + $0x558] sm:$0xff] }
  0xb7   :  { %1901 = vmatpush1.bf16.msra.mxu1 %v2763_v8  ;;  %1820 = vmatprep.subr.bf16.mxu0 %v2770_v9  ;;  %v198_v8 = vld [vmem:[%s4256_s1 + $0x578] sm:$0xff]  ;;  %v2825_v9 = vcombine.low %v185_v61, %v189_v62 }
  0xb8   :  { %1902 = vmatprep.subr.bf16.mxu1 %v2772_v10  ;;  %v2836_v12 = vcombine.high %v194_v7, %v198_v8 }
  0xba   :  { %1821 = vmatpush1.bf16.msra.mxu0 %v2769_v15  ;;  %v202_v15 = vld [vmem:[%s4256_s1 + $0x598] sm:$0xff] }
  0xbb   :  { %1903 = vmatpush1.bf16.msra.mxu1 %v2771_v16  ;;  %1822 = vmatprep.subr.bf16.mxu0 %v2778_v17  ;;  %v206_v16 = vld [vmem:[%s4256_s1 + $0x5b8] sm:$0xff]  ;;  %v2833_v17 = vcombine.low %v193_v5, %v197_v6 }
  0xbc   :  { %1904 = vmatprep.subr.bf16.mxu1 %v2780_v18  ;;  %v2835_v18 = vcombine.low %v194_v7, %v198_v8  ;;  %v2844_v20 = vcombine.high %v202_v15, %v206_v16  ;;  %v257_v7 = vld [vmem:[%s4256_s1 + $0x750] sm:$0xff] }
  0xbd   :  { %v261_v8 = vld [vmem:[%s4256_s1 + $0x770] sm:$0xff] }
  0xbe   :  { %1823 = vmatpush1.bf16.msra.mxu0 %v2777_v24  ;;  %v210_v24 = vld [vmem:[%s4256_s1 + $0x5d8] sm:$0xff] }
  0xbf   :  { %1905 = vmatpush1.bf16.msra.mxu1 %v2779_v25  ;;  %1824 = vmatprep.subr.bf16.mxu0 %v2786_v26  ;;  %v214_v25 = vld [vmem:[%s4256_s1 + $0x5f8] sm:$0xff]  ;;  %v2841_v26 = vcombine.low %v201_v13, %v205_v14  ;;  %v2898_v13 = vcombine.high %v257_v7, %v261_v8 }
  0xc0   :  { %1906 = vmatprep.subr.bf16.mxu1 %v2788_v27  ;;  %v2843_v27 = vcombine.low %v202_v15, %v206_v16  ;;  %v2852_v59 = vcombine.high %v210_v24, %v214_v25  ;;  %v265_v15 = vld [vmem:[%s4256_s1 + $0x790] sm:$0xff] }
  0xc1   :  { %v269_v16 = vld [vmem:[%s4256_s1 + $0x7b0] sm:$0xff] }
  0xc2   :  { %1825 = vmatpush1.bf16.msra.mxu0 %v2785_v32  ;;  %v218_v32 = vld [vmem:[%s4256_s1 + $0x618] sm:$0xff] }
  0xc3   :  { %1907 = vmatpush1.bf16.msra.mxu1 %v2787_v33  ;;  %1835 = vmatprep.subr.bf16.mxu0 %v2794_v34  ;;  %v222_v33 = vld [vmem:[%s4256_s1 + $0x638] sm:$0xff]  ;;  %v2849_v34 = vcombine.low %v209_v22, %v213_v23  ;;  %v2906_v22 = vcombine.high %v265_v15, %v269_v16 }
  0xc4   :  { %1917 = vmatprep.subr.bf16.mxu1 %v2796_v35  ;;  %v2851_v35 = vcombine.low %v210_v24, %v214_v25  ;;  %v2860_v37 = vcombine.high %v218_v32, %v222_v33  ;;  %v273_v24 = vld [vmem:[%s4256_s1 + $0x7d0] sm:$0xff] }
  0xc5   :  { %1827 = vmatmul.mubr.bf16.vlgmr.msra.gmra.mrb[4].mxu0 %v3445_v21  ;;  %v277_v25 = vld [vmem:[%s4256_s1 + $0x7f0] sm:$0xff] }
  0xc6   :  { %1836 = vmatpush1.bf16.msra.mxu0 %v2793_v40  ;;  %1909 = vmatmul.mubr.bf16.vlgmr.msra.gmra.mrb[4].mxu1 %v3445_v21  ;;  %v178_v21 = vld [vmem:[%s4256_s1 + $0x4d8] sm:$0xff] }
  0xc7   :  { %1918 = vmatpush1.bf16.msra.mxu1 %v2795_v41  ;;  %1837 = vmatprep.subr.bf16.mxu0 %v2802_v42  ;;  %v2820_v60 = vcombine.high %v178_v21, %v182_v3  ;;  %v2819_v1 = vcombine.low %v178_v21, %v182_v3  ;;  %v226_v40 = vld [vmem:[%s4256_s1 + $0x658] sm:$0xff]  ;;  %v2857_v42 = vcombine.low %v217_v28, %v221_v29  ;;  %v241_v21 = vld [vmem:[%s4256_s1 + $0x6d0] sm:$0xff] }
  0xc8   :  { %1919 = vmatprep.subr.bf16.mxu1 %v2804_v43  ;;  %1867 = vmatprep.mubr.bf16.mxu0 %v3467_v30  ;;  %v230_v41 = vld [vmem:[%s4256_s1 + $0x678] sm:$0xff]  ;;  %v2859_v43 = vcombine.low %v218_v32, %v222_v33  ;;  %v245_v3 = vld [vmem:[%s4256_s1 + $0x6f0] sm:$0xff]  ;;  %v2914_v28 = vcombine.high %v273_v24, %v277_v25  ;;  %v2913_v32 = vcombine.low %v273_v24, %v277_v25 }
  0xc9   :  { %1949 = vmatprep.mubr.bf16.mxu1 %v3467_v30  ;;  %v186_v30 = vld [vmem:[%s4256_s1 + $0x518] sm:$0xff]  ;;  %v2868_v45 = vcombine.high %v226_v40, %v230_v41  ;;  %v2882_v61 = vcombine.high %v241_v21, %v245_v3 }
  0xca   :  { %1838 = vmatpush1.bf16.msra.mxu0 %v2801_v49  ;;  %v2828_v4 = vcombine.high %v186_v30, %v190_v63  ;;  %v2827_v10 = vcombine.low %v186_v30, %v190_v63  ;;  %v234_v49 = vld [vmem:[%s4256_s1 + $0x698] sm:$0xff]  ;;  %v249_v30 = vld [vmem:[%s4256_s1 + $0x710] sm:$0xff] }
  0xcb   :  { %1920 = vmatpush1.bf16.msra.mxu1 %v2803_v50  ;;  %1839 = vmatprep.subr.bf16.mxu0 %v2810_v51  ;;  %v238_v50 = vld [vmem:[%s4256_s1 + $0x6b8] sm:$0xff]  ;;  %v2865_v51 = vcombine.low %v225_v38, %v229_v39  ;;  %v253_v63 = vld [vmem:[%s4256_s1 + $0x730] sm:$0xff]  ;;  %v3100_v38 = vld [vmem:[%s4258_s3 + $0x48] sm:$0xff]  }
  0xcc   :  { %1921 = vmatprep.subr.bf16.mxu1 %v2812_v52  ;;  %v2867_v52 = vcombine.low %v226_v40, %v230_v41  ;;  %v2876_v54 = vcombine.high %v234_v49, %v238_v50  ;;  %v2890_v5 = vcombine.high %v249_v30, %v253_v63  ;;  %v3101_v39 = vld [vmem:[%s4258_s3 + $0xc8] sm:$0xff]  }
  0xcd   :  { %v3102_v40 = vld [vmem:[%s4258_s3 + $0x8] sm:$0xff]  }
  0xce   :  { %1840 = vmatpush1.bf16.msra.mxu0 %v2809_v55  ;;  %v242_v55 = vld [vmem:[%s4256_s1 + $0x6d8] sm:$0xff]  ;;  %v3103_v41 = vld [vmem:[%s4258_s3 + $0x88] sm:$0xff]  }
  0xcf   :  { %1922 = vmatpush1.bf16.msra.mxu1 %v2811_v57  ;;  %1841 = vmatprep.subr.bf16.mxu0 %v2818_v58  ;;  %v246_v57 = vld [vmem:[%s4256_s1 + $0x6f8] sm:$0xff]  ;;  %v2873_v58 = vcombine.low %v233_v47, %v237_v48 }
  0xd0   :  { %1923 = vmatprep.subr.bf16.mxu1 %v2820_v60  ;;  %v2875_v60 = vcombine.low %v234_v49, %v238_v50  ;;  %v2884_v62 = vcombine.high %v242_v55, %v246_v57  ;;  %v3109_v47 = vld [vmem:[%s4258_s3 + $0xd8] sm:$0xff]   ;;  %v3112_v50 = vld [vmem:[%s4258_s3 + $0x60] sm:$0xff]  }
  0xd1   :  { %v3110_v48 = vld [vmem:[%s4258_s3 + $0x18] sm:$0xff]  }
  0xd2   :  { %1842 = vmatpush1.bf16.msra.mxu0 %v2817_v0  ;;  %v250_v0 = vld [vmem:[%s4256_s1 + $0x718] sm:$0xff] }
  0xd3   :  { %1924 = vmatpush1.bf16.msra.mxu1 %v2819_v1  ;;  %1843 = vmatprep.subr.bf16.mxu0 %v2826_v2  ;;  %v254_v1 = vld [vmem:[%s4256_s1 + $0x738] sm:$0xff]  ;;  %v2881_v2 = vcombine.low %v241_v21, %v245_v3  ;;  %v3117_v21 = vld [vmem:[%s4258_s3 + $0xe8] sm:$0xff]  }
  0xd4   :  { %1925 = vmatprep.subr.bf16.mxu1 %v2828_v4  ;;  %v2883_v4 = vcombine.low %v242_v55, %v246_v57  ;;  %v2892_v6 = vcombine.high %v250_v0, %v254_v1  ;;  %v3111_v49 = vld [vmem:[%s4258_s3 + $0x98] sm:$0xff]   ;;  %v3118_v3 = vld [vmem:[%s4258_s3 + $0x28] sm:$0xff]   ;;  %v3120_v57 = vld [vmem:[%s4258_s3 + $0x70] sm:$0xff]  }
  0xd5   :  { %v3119_v55 = vld [vmem:[%s4258_s3 + $0xa8] sm:$0xff]  }
  0xd6   :  { %1844 = vmatpush1.bf16.msra.mxu0 %v2825_v9  ;;  %v258_v9 = vld [vmem:[%s4256_s1 + $0x758] sm:$0xff] }
  0xd7   :  { %1926 = vmatpush1.bf16.msra.mxu1 %v2827_v10  ;;  %1845 = vmatprep.subr.bf16.mxu0 %v2834_v11  ;;  %v262_v10 = vld [vmem:[%s4256_s1 + $0x778] sm:$0xff]  ;;  %v2889_v11 = vcombine.low %v249_v30, %v253_v63 }
  0xd8   :  { %1927 = vmatprep.subr.bf16.mxu1 %v2836_v12  ;;  %v2891_v12 = vcombine.low %v250_v0, %v254_v1  ;;  %v2900_v14 = vcombine.high %v258_v9, %v262_v10  ;;  %v3125_v30 = vld [vmem:[%s4258_s3 + $0xf8] sm:$0xff]   ;;  %v3128_v1 = vld [vmem:[%s4258_s3 + $0x140] sm:$0xff]  }
  0xd9   :  { %v3126_v63 = vld [vmem:[%s4258_s3 + $0x38] sm:$0xff]  }
  0xda   :  { %1846 = vmatpush1.bf16.msra.mxu0 %v2833_v17  ;;  %v266_v17 = vld [vmem:[%s4256_s1 + $0x798] sm:$0xff] }
  0xdb   :  { %1928 = vmatpush1.bf16.msra.mxu1 %v2835_v18  ;;  %1847 = vmatprep.subr.bf16.mxu0 %v2842_v19  ;;  %v270_v18 = vld [vmem:[%s4256_s1 + $0x7b8] sm:$0xff]  ;;  %v2897_v19 = vcombine.low %v257_v7, %v261_v8  ;;  %v287_v7 = vsub.s32 1, %v3288_v46  ;;  %v295_v8 = vsub.s32 3, %v3288_v46 }
  0xdc   :  { %1929 = vmatprep.subr.bf16.mxu1 %v2844_v20  ;;  %v2899_v20 = vcombine.low %v258_v9, %v262_v10  ;;  %v2908_v23 = vcombine.high %v266_v17, %v270_v18  ;;  %v3127_v0 = vld [vmem:[%s4258_s3 + $0xb8] sm:$0xff]  }
  0xde   :  { %1848 = vmatpush1.bf16.msra.mxu0 %v2841_v26  ;;  %v274_v26 = vld [vmem:[%s4256_s1 + $0x7d8] sm:$0xff] }
  0xdf   :  { %1930 = vmatpush1.bf16.msra.mxu1 %v2843_v27  ;;  %1849 = vmatprep.subr.bf16.mxu0 %v2850_v56  ;;  %v278_v27 = vld [vmem:[%s4256_s1 + $0x7f8] sm:$0xff]  ;;  %v2905_v56 = vcombine.low %v265_v15, %v269_v16 }
  0xe0   :  { %1931 = vmatprep.subr.bf16.mxu1 %v2852_v59  ;;  %v2907_v59 = vcombine.low %v266_v17, %v270_v18  ;;  %v2916_v29 = vcombine.high %v274_v26, %v278_v27  ;;  %v2915_v33 = vcombine.low %v274_v26, %v278_v27  ;;  %v3130_v27 = vld [vmem:[%s4258_s3 + $0x100] sm:$0xff]  }
  0xe2   :  { %1850 = vmatpush1.bf16.msra.mxu0 %v2849_v34  ;;  %v3096_v34 = vld [vmem:[%s4258_s3 + $0x40] sm:$0xff]  }
  0xe3   :  { %1932 = vmatpush1.bf16.msra.mxu1 %v2851_v35  ;;  %1851 = vmatprep.subr.bf16.mxu0 %v2858_v36  ;;  %v3097_v35 = vld [vmem:[%s4258_s3 + $0xc0] sm:$0xff]  }
  0xe4   :  { %1933 = vmatprep.subr.bf16.mxu1 %v2860_v37  ;;  %v3098_v36 = vld [vmem:[%s4258_s3] sm:$0xff]  }
  0xe5   :  { %v3099_v37 = vld [vmem:[%s4258_s3 + $0x80] sm:$0xff]  }
  0xe6   :  { %1852 = vmatpush1.bf16.msra.mxu0 %v2857_v42  ;;  %v3104_v42 = vld [vmem:[%s4258_s3 + $0x50] sm:$0xff]  }
  0xe7   :  { %1934 = vmatpush1.bf16.msra.mxu1 %v2859_v43  ;;  %1853 = vmatprep.subr.bf16.mxu0 %v2866_v44  ;;  %v3106_v43 = vld [vmem:[%s4258_s3 + $0x10] sm:$0xff]  }
  0xe8   :  { %1935 = vmatprep.subr.bf16.mxu1 %v2868_v45  ;;  %v3107_v44 = vld [vmem:[%s4258_s3 + $0x90] sm:$0xff]   ;;  %v3108_v45 = vld [vmem:[%s4258_s3 + $0x58] sm:$0xff]  }
  0xea   :  { %1854 = vmatpush1.bf16.msra.mxu0 %v2865_v51  ;;  %v3113_v51 = vld [vmem:[%s4258_s3 + $0xe0] sm:$0xff]  }
  0xeb   :  { %1936 = vmatpush1.bf16.msra.mxu1 %v2867_v52  ;;  %1855 = vmatprep.subr.bf16.mxu0 %v2874_v53  ;;  %v3114_v52 = vld [vmem:[%s4258_s3 + $0x20] sm:$0xff]  }
  0xec   :  { %1937 = vmatprep.subr.bf16.mxu1 %v2876_v54  ;;  %v3115_v53 = vld [vmem:[%s4258_s3 + $0xa0] sm:$0xff]   ;;  %v3116_v54 = vld [vmem:[%s4258_s3 + $0x68] sm:$0xff]  }
  0xee   :  { %1856 = vmatpush1.bf16.msra.mxu0 %v2873_v58  ;;  %v3121_v58 = vld [vmem:[%s4258_s3 + $0xf0] sm:$0xff]  }
  0xef   :  { %1938 = vmatpush1.bf16.msra.mxu1 %v2875_v60  ;;  %1857 = vmatprep.subr.bf16.mxu0 %v2882_v61  ;;  %v3122_v60 = vld [vmem:[%s4258_s3 + $0x30] sm:$0xff]  }
  0xf0   :  { %1939 = vmatprep.subr.bf16.mxu1 %v2884_v62  ;;  %v3123_v61 = vld [vmem:[%s4258_s3 + $0xb0] sm:$0xff]   ;;  %v3124_v62 = vld [vmem:[%s4258_s3 + $0x78] sm:$0xff]  }
  0xf2   :  { %1858 = vmatpush1.bf16.msra.mxu0 %v2881_v2  ;;  %v3129_v2 = vld [vmem:[%s4258_s3 + $0x1c0] sm:$0xff]  }
  0xf3   :  { %1940 = vmatpush1.bf16.msra.mxu1 %v2883_v4  ;;  %1859 = vmatprep.subr.bf16.mxu0 %v2890_v5  ;;  %v283_v4 = vsub.s32 0, %v3288_v46  ;;  %v4133_v5 = vld [vmem:[%s4257_s2] sm:$0xff] }
  0xf4   :  { %1941 = vmatprep.subr.bf16.mxu1 %v2892_v6  ;;  %v291_v6 = vsub.s32 2, %v3288_v46 }
  0xf5   :  { %v284_v9 = vrot.slane %v4133_v5, %v283_v4 }
  0xf6   :  { %1860 = vmatpush1.bf16.msra.mxu0 %v2889_v11  ;;  %v292_v10 = vrot.slane %v4133_v5, %v291_v6  ;;  %v288_v11 = vrot.slane %v4133_v5, %v287_v7 }
  0xf7   :  { %1942 = vmatpush1.bf16.msra.mxu1 %v2891_v12  ;;  %1861 = vmatprep.subr.bf16.mxu0 %v2898_v13  ;;  %v296_v12 = vrot.slane %v4133_v5, %v295_v8 }
  0xf8   :  { %1943 = vmatprep.subr.bf16.mxu1 %v2900_v14 }
  0xfa   :  { %1862 = vmatpush1.bf16.msra.mxu0 %v2897_v19 }
  0xfb   :  { %1944 = vmatpush1.bf16.msra.mxu1 %v2899_v20  ;;  %1863 = vmatprep.subr.bf16.mxu0 %v2906_v22 }
  0xfc   :  { %1945 = vmatprep.subr.bf16.mxu1 %v2908_v23 }
  0xfe   :  { %1864 = vmatpush1.bf16.msra.mxu0 %v2905_v56 }
  0xff   :  { %1946 = vmatpush1.bf16.msra.mxu1 %v2907_v59  ;;  %1865 = vmatprep.subr.bf16.mxu0 %v2914_v28  ;;  %v3131_v28 = vld [vmem:[%s4258_s3 + $0x180] sm:$0xff]  }
 0x100   :  { %1947 = vmatprep.subr.bf16.mxu1 %v2916_v29  ;;  %v3132_v29 = vld [vmem:[%s4258_s3 + $0x148] sm:$0xff]  }
 0x102   :  { %1866 = vmatpush1.bf16.msra.mxu0 %v2913_v32 }
 0x103   :  { %1948 = vmatpush1.bf16.msra.mxu1 %v2915_v33  ;;  %2982 = vmatprep.subr.bf16.mxu0 %v3096_v34  ;;  %v3133_v33 = vld [vmem:[%s4258_s3 + $0x1c8] sm:$0xff]  }
 0x104   :  { %3004 = vmatprep.subr.bf16.mxu1 %v3097_v35  ;;  %v3134_v34 = vld [vmem:[%s4258_s3 + $0x108] sm:$0xff]  }
 0x105   :  { %1868 = vmatmul.mubr.bf16.vlgmr.msra.gmra.mrb[4].mxu0 %v3655_v31  ;;  %v3135_v35 = vld [vmem:[%s4258_s3 + $0x188] sm:$0xff]  }
 0x106   :  { %1950 = vmatmul.mubr.bf16.vlgmr.msra.gmra.mrb[4].mxu1 %v3655_v31  ;;  %2983 = vmatpush3.bf16.msra.mxu0 %v3098_v36  ;;  %v3105_v31 = vld [vmem:[%s4258_s3 + $0xd0] sm:$0xff]  }
 0x107   :  { %3005 = vmatpush3.bf16.msra.mxu1 %v3099_v37  ;;  %2984 = vmatprep.subr.bf16.mxu0 %v3100_v38  ;;  %v3136_v36 = vld [vmem:[%s4258_s3 + $0x150] sm:$0xff]  }
 0x108   :  { %3006 = vmatprep.subr.bf16.mxu1 %v3101_v39  ;;  %v3137_v37 = vld [vmem:[%s4258_s3 + $0x1d0] sm:$0xff]  }
 0x109   :  { %v3138_v38 = vld [vmem:[%s4258_s3 + $0x110] sm:$0xff]  }
 0x10a   :  { %2985 = vmatpush3.bf16.msra.mxu0 %v3102_v40  ;;  %v3139_v39 = vld [vmem:[%s4258_s3 + $0x190] sm:$0xff]   ;;  %v3140_v40 = vld [vmem:[%s4258_s3 + $0x158] sm:$0xff]  }
 0x10b   :  { %3007 = vmatpush3.bf16.msra.mxu1 %v3103_v41  ;;  %2986 = vmatprep.subr.bf16.mxu0 %v3104_v42  ;;  %v3141_v41 = vld [vmem:[%s4258_s3 + $0x1d8] sm:$0xff]  }
 0x10c   :  { %3008 = vmatprep.subr.bf16.mxu1 %v3105_v31  ;;  %v3142_v42 = vld [vmem:[%s4258_s3 + $0x118] sm:$0xff]  }
 0x10d   :  { %v3143_v31 = vld [vmem:[%s4258_s3 + $0x198] sm:$0xff]  }
 0x10e   :  { %2987 = vmatpush3.bf16.msra.mxu0 %v3106_v43  ;;  %v3144_v43 = vld [vmem:[%s4258_s3 + $0x160] sm:$0xff]  }
 0x10f   :  { %3009 = vmatpush3.bf16.msra.mxu1 %v3107_v44  ;;  %2988 = vmatprep.subr.bf16.mxu0 %v3108_v45  ;;  %v3145_v44 = vld [vmem:[%s4258_s3 + $0x1e0] sm:$0xff]  }
 0x110   :  { %3010 = vmatprep.subr.bf16.mxu1 %v3109_v47  ;;  %v3146_v45 = vld [vmem:[%s4258_s3 + $0x120] sm:$0xff]  }
 0x111   :  { %v3147_v47 = vld [vmem:[%s4258_s3 + $0x1a0] sm:$0xff]  }
 0x112   :  { %2989 = vmatpush3.bf16.msra.mxu0 %v3110_v48  ;;  %v3148_v48 = vld [vmem:[%s4258_s3 + $0x168] sm:$0xff]  }
 0x113   :  { %3011 = vmatpush3.bf16.msra.mxu1 %v3111_v49  ;;  %2990 = vmatprep.subr.bf16.mxu0 %v3112_v50  ;;  %v3149_v49 = vld [vmem:[%s4258_s3 + $0x1e8] sm:$0xff]  }
 0x114   :  { %3012 = vmatprep.subr.bf16.mxu1 %v3113_v51  ;;  %v3150_v50 = vld [vmem:[%s4258_s3 + $0x128] sm:$0xff]  }
 0x115   :  { %v3151_v51 = vld [vmem:[%s4258_s3 + $0x1a8] sm:$0xff]  }
 0x116   :  { %2991 = vmatpush3.bf16.msra.mxu0 %v3114_v52  ;;  %v3152_v52 = vld [vmem:[%s4258_s3 + $0x170] sm:$0xff]  }
 0x117   :  { %3013 = vmatpush3.bf16.msra.mxu1 %v3115_v53  ;;  %2992 = vmatprep.subr.bf16.mxu0 %v3116_v54  ;;  %v3153_v53 = vld [vmem:[%s4258_s3 + $0x1f0] sm:$0xff]  }
 0x118   :  { %3014 = vmatprep.subr.bf16.mxu1 %v3117_v21  ;;  %v3154_v54 = vld [vmem:[%s4258_s3 + $0x130] sm:$0xff]  }
 0x119   :  { %v3155_v21 = vld [vmem:[%s4258_s3 + $0x1b0] sm:$0xff]  }
 0x11a   :  { %2993 = vmatpush3.bf16.msra.mxu0 %v3118_v3  ;;  %v3156_v3 = vld [vmem:[%s4258_s3 + $0x178] sm:$0xff]  }
 0x11b   :  { %3015 = vmatpush3.bf16.msra.mxu1 %v3119_v55  ;;  %2994 = vmatprep.subr.bf16.mxu0 %v3120_v57  ;;  %v3157_v55 = vld [vmem:[%s4258_s3 + $0x1f8] sm:$0xff]  }
 0x11c   :  { %3016 = vmatprep.subr.bf16.mxu1 %v3121_v58  ;;  %v3158_v57 = vld [vmem:[%s4258_s3 + $0x138] sm:$0xff]  }
 0x11d   :  { %v3159_v58 = vld [vmem:[%s4258_s3 + $0x1b8] sm:$0xff]  }
 0x11e   :  { %2995 = vmatpush3.bf16.msra.mxu0 %v3122_v60  ;;  %v299_v60 = vsub.s32 4, %v3288_v46 }
 0x11f   :  { %3017 = vmatpush3.bf16.msra.mxu1 %v3123_v61  ;;  %2996 = vmatprep.subr.bf16.mxu0 %v3124_v62  ;;  %v307_v61 = vsub.s32 6, %v3288_v46  ;;  %v303_v62 = vsub.s32 5, %v3288_v46 }
 0x120   :  { %3018 = vmatprep.subr.bf16.mxu1 %v3125_v30  ;;  %v311_v30 = vsub.s32 7, %v3288_v46 }
 0x122   :  { %2997 = vmatpush3.bf16.msra.mxu0 %v3126_v63  ;;  %v300_v63 = vrot.slane %v4133_v5, %v299_v60 }
 0x123   :  { %3019 = vmatpush3.bf16.msra.mxu1 %v3127_v0  ;;  %3026 = vmatprep.subr.bf16.mxu0 %v3128_v1  ;;  %v308_v0 = vrot.slane %v4133_v5, %v307_v61  ;;  %v304_v1 = vrot.slane %v4133_v5, %v303_v62 }
 0x124   :  { %3048 = vmatprep.subr.bf16.mxu1 %v3129_v2  ;;  %v312_v2 = vrot.slane %v4133_v5, %v311_v30 }
 0x158   :  { %v1705_v13 = vpop.f32.mrb[0].mxu0 }
 0x159   :  { %v3070_v14 = vadd.f32 %v1705_v13, %v284_v9  ;;  %v1787_v15 = vpop.f32.mrb[0].mxu1  ;;  %v1707_v16 = vpop.f32.mrb[1].mxu0 }
 0x15a   :  { %v3072_v17 = vadd.f32 %v1787_v15, %v292_v10  ;;  %v3071_v18 = vadd.f32 %v1707_v16, %v288_v11  ;;  %v1789_v19 = vpop.f32.mrb[1].mxu1  ;;  %v1709_v20 = vpop.f32.mrb[2].mxu0 }
 0x15b   :  { %v3073_v22 = vadd.f32 %v1789_v19, %v296_v12  ;;  %v1791_v23 = vpop.f32.mrb[2].mxu1  ;;  %v1710_v24 = vpop.f32.mrb[3].mxu0  ;;  %v1958_v56 = vpack.c.bf16 %v3070_v14, %v3070_v14 }
 0x15c   :  { %v1959_v25 = vpack.c.bf16 %v3071_v18, %v3071_v18  ;;  %v1792_v26 = vpop.f32.mrb[3].mxu1  ;;  %v1960_v32 = vpack.c.bf16 %v3072_v17, %v3072_v17 }
 0x15d   :  { %v1961_v59 = vpack.c.bf16 %v3073_v22, %v3073_v22  ;;  %v2917_v22 = vld [vmem:[%s4259_s4] ss:$0 sm:$0xff]  ;;  %s3185_s4 = smov [#allocation2]  }
 0x15e   :  { %2517 = vmatprep.mubr.bf16.mxu0 %v1959_v25  ;;  %s2652_s0 = sshll.u32 %s3185_s4, 4  ;;  %s2653_s0 = int_to_ptr.vmem [resolvable:$true] %s2652_s0 }
 0x15f   :  { %2557 = vmatprep.mubr.bf16.mxu1 %v1961_v59  ;;  %2518 = vmatmul.mubr.bf16.vlgmr.msra.gmra.mrb[8].mxu0 %v1958_v56  ;;  %s3160_s8 = scalar_lea.vmem %s2653_s0, 32  ;;  %p3165_p1 = scmp.lt.s32.totalorder %s2653_s0, %s2653_s0 }
 0x160   :  { %2558 = vmatmul.mubr.bf16.vlgmr.msra.gmra.mrb[8].mxu1 %v1960_v32  ;;  %3027 = vmatpush3.bf16.msra.mxu0 %v3130_v27  ;;  %p3161_p0 = scmp.ne.s32.totalorder %s2653_s0, %s3160_s8  ;;  %p3166_p2 = scmp.lt.s32.totalorder %s3160_s8, %s3160_s8 }
 0x161   :  { %3049 = vmatpush3.bf16.msra.mxu1 %v3131_v28  ;;  %3028 = vmatprep.subr.bf16.mxu0 %v3132_v29 }
 0x162   :  { %3050 = vmatprep.subr.bf16.mxu1 %v3133_v33  ;;  %p3167_p3 = por %p3166_p2, %p3165_p1 }
 0x164   :  { %3029 = vmatpush3.bf16.msra.mxu0 %v3134_v34  ;;  %p3168_p4 = pnand %p3167_p3, %p3161_p0 }
 0x165   :  { %3051 = vmatpush3.bf16.msra.mxu1 %v3135_v35  ;;  %3030 = vmatprep.subr.bf16.mxu0 %v3136_v36 }
 0x166   :  { %3052 = vmatprep.subr.bf16.mxu1 %v3137_v37 }
 0x168   :  { %3031 = vmatpush3.bf16.msra.mxu0 %v3138_v38 }
 0x169   :  { %3053 = vmatpush3.bf16.msra.mxu1 %v3139_v39  ;;  %3032 = vmatprep.subr.bf16.mxu0 %v3140_v40 }
 0x16a   :  { %3054 = vmatprep.subr.bf16.mxu1 %v3141_v41 }
 0x16c   :  { %3033 = vmatpush3.bf16.msra.mxu0 %v3142_v42 }
 0x16d   :  { %3055 = vmatpush3.bf16.msra.mxu1 %v3143_v31  ;;  %3034 = vmatprep.subr.bf16.mxu0 %v3144_v43 }
 0x16e   :  { %3056 = vmatprep.subr.bf16.mxu1 %v3145_v44 }
 0x170   :  { %3035 = vmatpush3.bf16.msra.mxu0 %v3146_v45 }
 0x171   :  { %3057 = vmatpush3.bf16.msra.mxu1 %v3147_v47  ;;  %3036 = vmatprep.subr.bf16.mxu0 %v3148_v48 }
 0x172   :  { %3058 = vmatprep.subr.bf16.mxu1 %v3149_v49 }
 0x174   :  { %3037 = vmatpush3.bf16.msra.mxu0 %v3150_v50 }
 0x175   :  { %3059 = vmatpush3.bf16.msra.mxu1 %v3151_v51  ;;  %3038 = vmatprep.subr.bf16.mxu0 %v3152_v52 }
 0x176   :  { %3060 = vmatprep.subr.bf16.mxu1 %v3153_v53 }
 0x178   :  { %3039 = vmatpush3.bf16.msra.mxu0 %v3154_v54 }
 0x179   :  { %3061 = vmatpush3.bf16.msra.mxu1 %v3155_v21  ;;  %3040 = vmatprep.subr.bf16.mxu0 %v3156_v3 }
 0x17a   :  { %3062 = vmatprep.subr.bf16.mxu1 %v3157_v55 }
 0x17c   :  { %3041 = vmatpush3.bf16.msra.mxu0 %v3158_v57 }
 0x17d   :  { %3063 = vmatpush3.bf16.msra.mxu1 %v3159_v58 }
 0x1d8   :  { %v1869_v4 = vpop.f32.mrb[4].mxu0 }
 0x1d9   :  { %v3074_v6 = vadd.f32 %v1869_v4, %v300_v63  ;;  %v1951_v7 = vpop.f32.mrb[4].mxu1  ;;  %v1871_v8 = vpop.f32.mrb[5].mxu0 }
 0x1da   :  { %v3076_v9 = vadd.f32 %v1951_v7, %v308_v0  ;;  %v3075_v10 = vadd.f32 %v1871_v8, %v304_v1  ;;  %v1953_v11 = vpop.f32.mrb[5].mxu1  ;;  %v1873_v12 = vpop.f32.mrb[6].mxu0 }
 0x1db   :  { %v3077_v13 = vadd.f32 %v1953_v11, %v312_v2  ;;  %v1955_v14 = vpop.f32.mrb[6].mxu1  ;;  %v1874_v15 = vpop.f32.mrb[7].mxu0  ;;  %v1962_v17 = vpack.c.bf16 %v3074_v6, %v3074_v6 }
 0x1dc   :  { %v1963_v46 = vpack.c.bf16 %v3075_v10, %v3075_v10  ;;  %v1956_v16 = vpop.f32.mrb[7].mxu1  ;;  %v1964_v19 = vpack.c.bf16 %v3076_v9, %v3076_v9 }
 0x1dd   :  { %v1965_v18 = vpack.c.bf16 %v3077_v13, %v3077_v13 }
 0x1de   :  { %2597 = vmatprep.mubr.bf16.mxu0 %v1963_v46 }
 0x1df   :  { %2637 = vmatprep.mubr.bf16.mxu1 %v1965_v18  ;;  %2598 = vmatmul.mubr.bf16.vlgmr.msra.gmra.mrb[12].mxu0 %v1962_v17 }
 0x1e0   :  { %2638 = vmatmul.mubr.bf16.vlgmr.msra.gmra.mrb[12].mxu1 %v1964_v19 }
 0x232   :  { %v2998_v5 = vpop.f32.mrb[8].mxu0 }
 0x233   :  { %v3020_v20 = vpop.f32.mrb[8].mxu1  ;;  %v2999_v23 = vpop.f32.mrb[9].mxu0 }
 0x234   :  { %v3000_v24 = vadd.f32 %v2999_v23, %v2998_v5  ;;  %v3021_v25 = vpop.f32.mrb[9].mxu1  ;;  %v3001_v26 = vpop.f32.mrb[10].mxu0 }
 0x235   :  { %v3022_v27 = vadd.f32 %v3021_v25, %v3020_v20  ;;  %v3023_v56 = vpop.f32.mrb[10].mxu1  ;;  %v3002_v59 = vpop.f32.mrb[11].mxu0 }
 0x236   :  { %v2520_v28 = vadd.f32 %v3000_v24, %v2917_v22  ;;  %v3024_v29 = vpop.f32.mrb[11].mxu1 }
 0x238   :  { %v2560_v32 = vadd.f32 %v3022_v27, %v2520_v28 }
 0x2b2   :  { %v3042_v33 = vpop.f32.mrb[12].mxu0 }
 0x2b3   :  { %v3064_v34 = vpop.f32.mrb[12].mxu1  ;;  %v3043_v35 = vpop.f32.mrb[13].mxu0 }
 0x2b4   :  { %v3044_v36 = vadd.f32 %v3043_v35, %v3042_v33  ;;  %v3065_v37 = vpop.f32.mrb[13].mxu1  ;;  %v3045_v38 = vpop.f32.mrb[14].mxu0 }
 0x2b5   :  { %v3066_v39 = vadd.f32 %v3065_v37, %v3064_v34  ;;  %v3067_v40 = vpop.f32.mrb[14].mxu1  ;;  %v3046_v41 = vpop.f32.mrb[15].mxu0 }
 0x2b6   :  { %v2600_v42 = vadd.f32 %v3044_v36, %v2560_v32  ;;  %v3068_v31 = vpop.f32.mrb[15].mxu1 }
 0x2b8   :  { %v2640_v43 = vadd.f32 %v3066_v39, %v2600_v42 }
 0x2ba   :  { %2645 = vst [vmem:[#allocation2] sm:$0x3] %v2640_v43 }
 0x2bb   :  { %3171 = shalt.err (!%p3168_p4)
}
 0x2bc   :  { %s3172_s11 = scalar_lea.hbm %s4260_s5, 32 }
 0x2bd   :  { %p3173_p5 = scmp.ne.s32.totalorder %s4260_s5, %s3172_s11  ;;  %p3176_p6 = scmp.lt.u32.totalorder %s3172_s11, %s4260_s5 }
 0x2bf   :  { %p3178_p7 = pnand %p3176_p6, %p3173_p5 }
 0x2c1   :  { %3181 = shalt.err (!%p3178_p7)
}
 0x2c2   :  { %2655 = dma.vmem_to_hbm [thread:$0]  %s2653_s0, 32, %s4260_s5, [#allocation3]  }
 0x2c3   :  { %3182 = dma.done.wait [#allocation3], 32  }
 0x2c4   :  { %3183 = vsyncadd [#allocation3], 4294967264 }
 0x2c5   :  { %2659 = vsyncpa [#allocation3], 1 }

</bundles_post_ra>
